<compile_context>
chip_gen: v6e
topology: v6e:2x2x1
jax: 0.10.0
libtpu: 0.0.40
codegen_flags: <defaults>
</compile_context>

<pallas_src>
import jax
import jax.numpy as jnp
from jax.experimental import pallas as pl
from jax.experimental.pallas import tpu as pltpu

NUM_LAYER = 2
EMB_DIM = 32
FEAT_DIM = 8
MAX_DEPTH = 10
BN_EPS = 1e-5

NODES_PER_GRAPH = 16
GRAPHS_PER_BLOCK = 8                      # 8 graphs * 16 nodes = 128-row tiles
NODES_PER_BLOCK = GRAPHS_PER_BLOCK * NODES_PER_GRAPH
NUM_GRAPHS = 64                           # batched graphs per call
NUM_BLOCKS = NUM_GRAPHS // GRAPHS_PER_BLOCK
ENC_IN = FEAT_DIM + MAX_DEPTH + 1         # [feat | onehot(depth) | 1]


# ------------------------------ fused kernel --------------------------------

def gnn_fused_kernel(x_ref, adj_ref, encw_ref, ws_ref, bs_ref, so_ref, to_ref,
                     out_ref):
    # Fused node encoder: [feat | onehot(depth) | 1] @ [W_enc ; depth_emb ; b_enc]
    h = jnp.dot(x_ref[...], encw_ref[...], preferred_element_type=jnp.float32)

    a = adj_ref[...]                      # (NPB, NPB) bf16 block-diagonal adjacency
    bs = bs_ref[...]                      # (NUM_LAYER*3, D) f32 folded biases
    so = so_ref[...]                      # (NUM_LAYER, D)  f32 outer-BN scale
    to = to_ref[...]                      # (NUM_LAYER, D)  f32 outer-BN shift

    for layer in range(NUM_LAYER):
        # GIN 'sum' aggregation, eps=0: (1+eps)*h_i + sum_j h_j == h + A @ h
        # (self term is a free VPU add under MXU slack; no A+I materialized)
        x = h + jnp.dot(a, h.astype(jnp.bfloat16),
                        preferred_element_type=jnp.float32)
        # apply_func MLP: 3 x (Linear with eval-BN folded into W,b -> ReLU)
        for j in range(3):
            r = layer * 3 + j
            x = jnp.dot(x.astype(jnp.bfloat16), ws_ref[r],
                        preferred_element_type=jnp.float32) + bs[r:r + 1]
            x = jnp.maximum(x, 0.0)
        # outer per-layer BatchNorm (eval, scale/shift) after the MLP's ReLU
        x = x * so[layer:layer + 1] + to[layer:layer + 1]
        if layer < NUM_LAYER - 1:         # F.relu for all layers except the last
            x = jnp.maximum(x, 0.0)
        # F.dropout: identity in eval mode
        h = x

    out_ref[...] = h


# ------------------------------ wrapper --------------------------------------

def gnn_forward(x_in, adj_bd, kparams):
    """x_in: (NUM_BLOCKS*NODES_PER_BLOCK, ENC_IN) bf16, adj_bd: (NUM_BLOCKS, NPB, NPB) bf16."""
    nb = adj_bd.shape[0]
    total = nb * NODES_PER_BLOCK
    const2 = lambda b: (0, 0)
    const3 = lambda b: (0, 0, 0)
    return pl.pallas_call(
        gnn_fused_kernel,
        grid=(nb,),
        in_specs=[
            pl.BlockSpec((NODES_PER_BLOCK, ENC_IN), lambda b: (b, 0)),
            pl.BlockSpec((None, NODES_PER_BLOCK, NODES_PER_BLOCK),
                         lambda b: (b, 0, 0)),
            pl.BlockSpec((ENC_IN, EMB_DIM), const2),                   # resident
            pl.BlockSpec((NUM_LAYER * 3, EMB_DIM, EMB_DIM), const3),   # resident
            pl.BlockSpec((NUM_LAYER * 3, EMB_DIM), const2),            # resident
            pl.BlockSpec((NUM_LAYER, EMB_DIM), const2),                # resident
            pl.BlockSpec((NUM_LAYER, EMB_DIM), const2),                # resident
        ],
        out_specs=pl.BlockSpec((NODES_PER_BLOCK, EMB_DIM), lambda b: (b, 0)),
        out_shape=jax.ShapeDtypeStruct((total, EMB_DIM), jnp.float32),
        compiler_params=pltpu.CompilerParams(
            dimension_semantics=("parallel",)),   # shard graph-blocks across v7x TCs
    )(x_in, adj_bd, kparams["enc_w"], kparams["ws"],
      kparams["bs"], kparams["so"], kparams["to"])


def prepare_batched_inputs(feat, depth, adj):
    """Done ONCE per batched graph (analogous to DGL graph batching), outside the jit."""
    ng = feat.shape[0]
    assert ng % GRAPHS_PER_BLOCK == 0
    nb = ng // GRAPHS_PER_BLOCK
    onehot = jax.nn.one_hot(depth, MAX_DEPTH, dtype=jnp.float32)
    ones = jnp.ones((ng, NODES_PER_GRAPH, 1), jnp.float32)
    x_in = jnp.concatenate([feat, onehot, ones], axis=-1)
    x_in = x_in.reshape(nb * NODES_PER_BLOCK, ENC_IN).astype(jnp.bfloat16)
    # per-block block-diagonal adjacency (A[dst, src] = 1, no cross-graph edges)
    adj_blocks = adj.reshape(nb, GRAPHS_PER_BLOCK, NODES_PER_GRAPH, NODES_PER_GRAPH)
    eye_g = jnp.eye(GRAPHS_PER_BLOCK, dtype=adj.dtype)
    adj_bd = jnp.einsum('bgij,gh->bgihj', adj_blocks, eye_g)
    adj_bd = adj_bd.reshape(nb, NODES_PER_BLOCK, NODES_PER_BLOCK).astype(jnp.bfloat16)
    return x_in, adj_bd


# ----------------------------- parameter init --------------------------------

class _KeyGen:
    def __init__(self, key):
        self._key = key

    def __call__(self):
        self._key, sub = jax.random.split(self._key)
        return sub


def init_raw_params(key):
    kg = _KeyGen(key)

    def nrm(shape, s=0.1):
        return (s * jax.random.normal(kg(), shape)).astype(jnp.float32)

    raw = {
        "enc_w": nrm((FEAT_DIM, EMB_DIM)),
        "enc_b": nrm((EMB_DIM,)),
        "depth_emb": nrm((MAX_DEPTH, EMB_DIM)),
        "layers": [],
    }
    for _ in range(NUM_LAYER):
        lp = {"sub": []}
        for _j in range(3):
            lp["sub"].append({
                "w": nrm((EMB_DIM, EMB_DIM)),
                "b": nrm((EMB_DIM,)),
                "gamma": 1.0 + nrm((EMB_DIM,)),
                "beta": nrm((EMB_DIM,)),
                "mean": nrm((EMB_DIM,)),
                "var": 1.0 + jnp.abs(nrm((EMB_DIM,))),
            })
        lp["bn"] = {
            "gamma": 1.0 + nrm((EMB_DIM,)),
            "beta": nrm((EMB_DIM,)),
            "mean": nrm((EMB_DIM,)),
            "var": 1.0 + jnp.abs(nrm((EMB_DIM,))),
        }
        raw["layers"].append(lp)
    return raw


def _bn_scale_shift(bn):
    s = bn["gamma"] / jnp.sqrt(bn["var"] + BN_EPS)
    t = bn["beta"] - bn["mean"] * s
    return s, t


def fold_params(raw):
    """Fold eval BN into Linear weights; stack encoder weight/emb/bias; pack slabs."""
    ws, bs, so, to = [], [], [], []
    for lp in raw["layers"]:
        for sub in lp["sub"]:
            s, t = _bn_scale_shift(sub)
            ws.append(sub["w"] * s[None, :])          # scale output channels
            bs.append(sub["b"] * s + t)
        s, t = _bn_scale_shift(lp["bn"])
        so.append(s)
        to.append(t)
    enc_w_cat = jnp.concatenate(
        [raw["enc_w"], raw["depth_emb"], raw["enc_b"][None, :]], axis=0)
    return {
        "enc_w": enc_w_cat.astype(jnp.bfloat16),       # (ENC_IN, D)
        "ws": jnp.stack(ws).astype(jnp.bfloat16),      # (NUM_LAYER*3, D, D)
        "bs": jnp.stack(bs).astype(jnp.float32),       # (NUM_LAYER*3, D)
        "so": jnp.stack(so).astype(jnp.float32),       # (NUM_LAYER, D)
        "to": jnp.stack(to).astype(jnp.float32),       # (NUM_LAYER, D)
    }


# ------------------------------ pure-JAX reference ---------------------------

def gnn_reference(feat, depth, adj, raw):
    """Unfolded f32 reference mirroring the PyTorch module's eval-mode math."""
    h = feat @ raw["enc_w"] + raw["enc_b"] + raw["depth_emb"][depth]
    for layer in range(NUM_LAYER):
        lp = raw["layers"][layer]
        x = h + jnp.einsum('gij,gjd->gid', adj, h)
        for sub in lp["sub"]:
            x = x @ sub["w"] + sub["b"]
            s, t = _bn_scale_shift(sub)
            x = jnp.maximum(x * s + t, 0.0)
        s, t = _bn_scale_shift(lp["bn"])
        x = x * s + t
        if layer < NUM_LAYER - 1:
            x = jnp.maximum(x, 0.0)
        h = x
    return h


# ---------------------------------- main -------------------------------------

if __name__ == "__main__":
    key = jax.random.PRNGKey(0)
    k_feat, k_depth, k_adj, k_par = jax.random.split(key, 4)

    feat = jax.random.normal(
        k_feat, (NUM_GRAPHS, NODES_PER_GRAPH, FEAT_DIM), dtype=jnp.float32)
    depth = jax.random.randint(
        k_depth, (NUM_GRAPHS, NODES_PER_GRAPH), 0, MAX_DEPTH)
    adj = jax.random.bernoulli(
        k_adj, 0.3, (NUM_GRAPHS, NODES_PER_GRAPH, NODES_PER_GRAPH)
    ).astype(jnp.float32)
    adj = adj * (1.0 - jnp.eye(NODES_PER_GRAPH, dtype=jnp.float32))

    raw = init_raw_params(k_par)
    kparams = fold_params(raw)

    # graph-batching preprocessing, done once (not inside the per-call jit)
    x_in, adj_bd = prepare_batched_inputs(feat, depth, adj)

    out_flat = jax.jit(gnn_forward)(x_in, adj_bd, kparams)
    out_flat = jax.block_until_ready(out_flat)
    out = out_flat.reshape(NUM_GRAPHS, NODES_PER_GRAPH, EMB_DIM)

    ref = gnn_reference(feat, depth, adj, raw)
    assert out.shape == (NUM_GRAPHS, NODES_PER_GRAPH, EMB_DIM)
    # bf16 matmul operands (f32 accumulation) => relaxed tolerance vs f32 reference
    assert jnp.allclose(out, ref, atol=1e-1, rtol=1e-1), \
        float(jnp.max(jnp.abs(out - ref)))

    # TODO(synk): virtual-node handling (DGL dynamic add/remove_edges), residual=True,
    # JK='sum', and training-mode dropout/BatchNorm are not implemented (defaults-only
    # eval forward path).
    print("KERNEL_OK")
</pallas_src>

<mosaic_0001>
module attributes {stable_mosaic.version = 11 : i64} {
  func.func @gnn_fused_kernel(%arg0: i32, %arg1: memref<128x19xbf16, #tpu.memory_space<vmem>>, %arg2: memref<1x128x128xbf16, #tpu.memory_space<vmem>>, %arg3: memref<19x32xbf16, #tpu.memory_space<vmem>>, %arg4: memref<6x32x32xbf16, #tpu.memory_space<vmem>>, %arg5: memref<6x32xf32, #tpu.memory_space<vmem>>, %arg6: memref<2x32xf32, #tpu.memory_space<vmem>>, %arg7: memref<2x32xf32, #tpu.memory_space<vmem>>, %arg8: memref<128x32xf32, #tpu.memory_space<vmem>>) attributes {dimension_semantics = [#tpu.dimension_semantics<parallel>], iteration_bounds = array<i64: 8>, scalar_prefetch = 0 : i64, scratch_operands = 0 : i64, tpu.core_type = #tpu.core_type<tc>, window_params = [{transform_indices = @transform_0, window_bounds = array<i64: 128, 19>}, {transform_indices = @transform_1, window_bounds = array<i64: 1, 128, 128>}, {pipeline_mode = #tpu.pipeline_mode<synchronous>, transform_indices = @transform_2, window_bounds = array<i64: 19, 32>}, {pipeline_mode = #tpu.pipeline_mode<synchronous>, transform_indices = @transform_3, window_bounds = array<i64: 6, 32, 32>}, {pipeline_mode = #tpu.pipeline_mode<synchronous>, transform_indices = @transform_4, window_bounds = array<i64: 6, 32>}, {pipeline_mode = #tpu.pipeline_mode<synchronous>, transform_indices = @transform_5, window_bounds = array<i64: 2, 32>}, {pipeline_mode = #tpu.pipeline_mode<synchronous>, transform_indices = @transform_6, window_bounds = array<i64: 2, 32>}, {transform_indices = @transform_7, window_bounds = array<i64: 128, 32>}]} {
    %c0 = arith.constant 0 : index
    %c0_0 = arith.constant 0 : index
    %0 = vector.load %arg1[%c0, %c0_0] : memref<128x19xbf16, #tpu.memory_space<vmem>>, vector<128x19xbf16>
    %c0_1 = arith.constant 0 : index
    %c0_2 = arith.constant 0 : index
    %1 = vector.load %arg3[%c0_1, %c0_2] : memref<19x32xbf16, #tpu.memory_space<vmem>>, vector<19x32xbf16>
    %cst = arith.constant dense<0.000000e+00> : vector<128x32xf32>
    %2 = tpu.matmul %0, %1, %cst {dimension_numbers = #tpu.dot_dimension_numbers<[1], [0], [0], [1], [0, 0, 1, 1], [], []>} : vector<128x19xbf16>, vector<19x32xbf16>, vector<128x32xf32> -> vector<128x32xf32>
    %c0_3 = arith.constant 0 : index
    %c0_4 = arith.constant 0 : index
    %c0_5 = arith.constant 0 : index
    %3 = vector.load %arg2[%c0_3, %c0_4, %c0_5] : memref<1x128x128xbf16, #tpu.memory_space<vmem>>, vector<1x128x128xbf16>
    %4 = vector.shape_cast %3 : vector<1x128x128xbf16> to vector<128x128xbf16>
    %c0_6 = arith.constant 0 : index
    %c0_7 = arith.constant 0 : index
    %5 = vector.load %arg5[%c0_6, %c0_7] : memref<6x32xf32, #tpu.memory_space<vmem>>, vector<6x32xf32>
    %c0_8 = arith.constant 0 : index
    %c0_9 = arith.constant 0 : index
    %6 = vector.load %arg6[%c0_8, %c0_9] : memref<2x32xf32, #tpu.memory_space<vmem>>, vector<2x32xf32>
    %c0_10 = arith.constant 0 : index
    %c0_11 = arith.constant 0 : index
    %7 = vector.load %arg7[%c0_10, %c0_11] : memref<2x32xf32, #tpu.memory_space<vmem>>, vector<2x32xf32>
    %8 = arith.truncf %2 : vector<128x32xf32> to vector<128x32xbf16>
    %cst_12 = arith.constant dense<0.000000e+00> : vector<128x32xf32>
    %9 = tpu.matmul %4, %8, %cst_12 {dimension_numbers = #tpu.dot_dimension_numbers<[1], [0], [0], [1], [0, 0, 1, 1], [], []>} : vector<128x128xbf16>, vector<128x32xbf16>, vector<128x32xf32> -> vector<128x32xf32>
    %10 = arith.addf %2, %9 : vector<128x32xf32>
    %11 = arith.truncf %10 : vector<128x32xf32> to vector<128x32xbf16>
    %c0_13 = arith.constant 0 : index
    %c0_14 = arith.constant 0 : index
    %c0_15 = arith.constant 0 : index
    %12 = vector.load %arg4[%c0_13, %c0_14, %c0_15] : memref<6x32x32xbf16, #tpu.memory_space<vmem>>, vector<1x32x32xbf16>
    %13 = vector.shape_cast %12 : vector<1x32x32xbf16> to vector<32x32xbf16>
    %cst_16 = arith.constant dense<0.000000e+00> : vector<128x32xf32>
    %14 = tpu.matmul %11, %13, %cst_16 {dimension_numbers = #tpu.dot_dimension_numbers<[1], [0], [0], [1], [0, 0, 1, 1], [], []>} : vector<128x32xbf16>, vector<32x32xbf16>, vector<128x32xf32> -> vector<128x32xf32>
    %15 = vector.extract_strided_slice %5 {offsets = [0, 0], sizes = [1, 32], strides = [1, 1]} : vector<6x32xf32> to vector<1x32xf32>
    %16 = vector.broadcast %15 : vector<1x32xf32> to vector<128x32xf32>
    %17 = arith.addf %14, %16 : vector<128x32xf32>
    %cst_17 = arith.constant 0.000000e+00 : f32
    %18 = vector.broadcast %cst_17 : f32 to vector<128x32xf32>
    %19 = arith.maximumf %17, %18 : vector<128x32xf32>
    %20 = arith.truncf %19 : vector<128x32xf32> to vector<128x32xbf16>
    %c1 = arith.constant 1 : index
    %c0_18 = arith.constant 0 : index
    %c0_19 = arith.constant 0 : index
    %21 = vector.load %arg4[%c1, %c0_18, %c0_19] : memref<6x32x32xbf16, #tpu.memory_space<vmem>>, vector<1x32x32xbf16>
    %22 = vector.shape_cast %21 : vector<1x32x32xbf16> to vector<32x32xbf16>
    %cst_20 = arith.constant dense<0.000000e+00> : vector<128x32xf32>
    %23 = tpu.matmul %20, %22, %cst_20 {dimension_numbers = #tpu.dot_dimension_numbers<[1], [0], [0], [1], [0, 0, 1, 1], [], []>} : vector<128x32xbf16>, vector<32x32xbf16>, vector<128x32xf32> -> vector<128x32xf32>
    %24 = vector.extract_strided_slice %5 {offsets = [1, 0], sizes = [1, 32], strides = [1, 1]} : vector<6x32xf32> to vector<1x32xf32>
    %25 = vector.broadcast %24 : vector<1x32xf32> to vector<128x32xf32>
    %26 = arith.addf %23, %25 : vector<128x32xf32>
    %cst_21 = arith.constant 0.000000e+00 : f32
    %27 = vector.broadcast %cst_21 : f32 to vector<128x32xf32>
    %28 = arith.maximumf %26, %27 : vector<128x32xf32>
    %29 = arith.truncf %28 : vector<128x32xf32> to vector<128x32xbf16>
    %c2 = arith.constant 2 : index
    %c0_22 = arith.constant 0 : index
    %c0_23 = arith.constant 0 : index
    %30 = vector.load %arg4[%c2, %c0_22, %c0_23] : memref<6x32x32xbf16, #tpu.memory_space<vmem>>, vector<1x32x32xbf16>
    %31 = vector.shape_cast %30 : vector<1x32x32xbf16> to vector<32x32xbf16>
    %cst_24 = arith.constant dense<0.000000e+00> : vector<128x32xf32>
    %32 = tpu.matmul %29, %31, %cst_24 {dimension_numbers = #tpu.dot_dimension_numbers<[1], [0], [0], [1], [0, 0, 1, 1], [], []>} : vector<128x32xbf16>, vector<32x32xbf16>, vector<128x32xf32> -> vector<128x32xf32>
    %33 = vector.extract_strided_slice %5 {offsets = [2, 0], sizes = [1, 32], strides = [1, 1]} : vector<6x32xf32> to vector<1x32xf32>
    %34 = vector.broadcast %33 : vector<1x32xf32> to vector<128x32xf32>
    %35 = arith.addf %32, %34 : vector<128x32xf32>
    %cst_25 = arith.constant 0.000000e+00 : f32
    %36 = vector.broadcast %cst_25 : f32 to vector<128x32xf32>
    %37 = arith.maximumf %35, %36 : vector<128x32xf32>
    %38 = vector.extract_strided_slice %6 {offsets = [0, 0], sizes = [1, 32], strides = [1, 1]} : vector<2x32xf32> to vector<1x32xf32>
    %39 = vector.broadcast %38 : vector<1x32xf32> to vector<128x32xf32>
    %40 = arith.mulf %37, %39 : vector<128x32xf32>
    %41 = vector.extract_strided_slice %7 {offsets = [0, 0], sizes = [1, 32], strides = [1, 1]} : vector<2x32xf32> to vector<1x32xf32>
    %42 = vector.broadcast %41 : vector<1x32xf32> to vector<128x32xf32>
    %43 = arith.addf %40, %42 : vector<128x32xf32>
    %cst_26 = arith.constant 0.000000e+00 : f32
    %44 = vector.broadcast %cst_26 : f32 to vector<128x32xf32>
    %45 = arith.maximumf %43, %44 : vector<128x32xf32>
    %46 = arith.truncf %45 : vector<128x32xf32> to vector<128x32xbf16>
    %cst_27 = arith.constant dense<0.000000e+00> : vector<128x32xf32>
    %47 = tpu.matmul %4, %46, %cst_27 {dimension_numbers = #tpu.dot_dimension_numbers<[1], [0], [0], [1], [0, 0, 1, 1], [], []>} : vector<128x128xbf16>, vector<128x32xbf16>, vector<128x32xf32> -> vector<128x32xf32>
    %48 = arith.addf %45, %47 : vector<128x32xf32>
    %49 = arith.truncf %48 : vector<128x32xf32> to vector<128x32xbf16>
    %c3 = arith.constant 3 : index
    %c0_28 = arith.constant 0 : index
    %c0_29 = arith.constant 0 : index
    %50 = vector.load %arg4[%c3, %c0_28, %c0_29] : memref<6x32x32xbf16, #tpu.memory_space<vmem>>, vector<1x32x32xbf16>
    %51 = vector.shape_cast %50 : vector<1x32x32xbf16> to vector<32x32xbf16>
    %cst_30 = arith.constant dense<0.000000e+00> : vector<128x32xf32>
    %52 = tpu.matmul %49, %51, %cst_30 {dimension_numbers = #tpu.dot_dimension_numbers<[1], [0], [0], [1], [0, 0, 1, 1], [], []>} : vector<128x32xbf16>, vector<32x32xbf16>, vector<128x32xf32> -> vector<128x32xf32>
    %53 = vector.extract_strided_slice %5 {offsets = [3, 0], sizes = [1, 32], strides = [1, 1]} : vector<6x32xf32> to vector<1x32xf32>
    %54 = vector.broadcast %53 : vector<1x32xf32> to vector<128x32xf32>
    %55 = arith.addf %52, %54 : vector<128x32xf32>
    %cst_31 = arith.constant 0.000000e+00 : f32
    %56 = vector.broadcast %cst_31 : f32 to vector<128x32xf32>
    %57 = arith.maximumf %55, %56 : vector<128x32xf32>
    %58 = arith.truncf %57 : vector<128x32xf32> to vector<128x32xbf16>
    %c4 = arith.constant 4 : index
    %c0_32 = arith.constant 0 : index
    %c0_33 = arith.constant 0 : index
    %59 = vector.load %arg4[%c4, %c0_32, %c0_33] : memref<6x32x32xbf16, #tpu.memory_space<vmem>>, vector<1x32x32xbf16>
    %60 = vector.shape_cast %59 : vector<1x32x32xbf16> to vector<32x32xbf16>
    %cst_34 = arith.constant dense<0.000000e+00> : vector<128x32xf32>
    %61 = tpu.matmul %58, %60, %cst_34 {dimension_numbers = #tpu.dot_dimension_numbers<[1], [0], [0], [1], [0, 0, 1, 1], [], []>} : vector<128x32xbf16>, vector<32x32xbf16>, vector<128x32xf32> -> vector<128x32xf32>
    %62 = vector.extract_strided_slice %5 {offsets = [4, 0], sizes = [1, 32], strides = [1, 1]} : vector<6x32xf32> to vector<1x32xf32>
    %63 = vector.broadcast %62 : vector<1x32xf32> to vector<128x32xf32>
    %64 = arith.addf %61, %63 : vector<128x32xf32>
    %cst_35 = arith.constant 0.000000e+00 : f32
    %65 = vector.broadcast %cst_35 : f32 to vector<128x32xf32>
    %66 = arith.maximumf %64, %65 : vector<128x32xf32>
    %67 = arith.truncf %66 : vector<128x32xf32> to vector<128x32xbf16>
    %c5 = arith.constant 5 : index
    %c0_36 = arith.constant 0 : index
    %c0_37 = arith.constant 0 : index
    %68 = vector.load %arg4[%c5, %c0_36, %c0_37] : memref<6x32x32xbf16, #tpu.memory_space<vmem>>, vector<1x32x32xbf16>
    %69 = vector.shape_cast %68 : vector<1x32x32xbf16> to vector<32x32xbf16>
    %cst_38 = arith.constant dense<0.000000e+00> : vector<128x32xf32>
    %70 = tpu.matmul %67, %69, %cst_38 {dimension_numbers = #tpu.dot_dimension_numbers<[1], [0], [0], [1], [0, 0, 1, 1], [], []>} : vector<128x32xbf16>, vector<32x32xbf16>, vector<128x32xf32> -> vector<128x32xf32>
    %71 = vector.extract_strided_slice %5 {offsets = [5, 0], sizes = [1, 32], strides = [1, 1]} : vector<6x32xf32> to vector<1x32xf32>
    %72 = vector.broadcast %71 : vector<1x32xf32> to vector<128x32xf32>
    %73 = arith.addf %70, %72 : vector<128x32xf32>
    %cst_39 = arith.constant 0.000000e+00 : f32
    %74 = vector.broadcast %cst_39 : f32 to vector<128x32xf32>
    %75 = arith.maximumf %73, %74 : vector<128x32xf32>
    %76 = vector.extract_strided_slice %6 {offsets = [1, 0], sizes = [1, 32], strides = [1, 1]} : vector<2x32xf32> to vector<1x32xf32>
    %77 = vector.broadcast %76 : vector<1x32xf32> to vector<128x32xf32>
    %78 = arith.mulf %75, %77 : vector<128x32xf32>
    %79 = vector.extract_strided_slice %7 {offsets = [1, 0], sizes = [1, 32], strides = [1, 1]} : vector<2x32xf32> to vector<1x32xf32>
    %80 = vector.broadcast %79 : vector<1x32xf32> to vector<128x32xf32>
    %81 = arith.addf %78, %80 : vector<128x32xf32>
    %c0_40 = arith.constant 0 : index
    %c0_41 = arith.constant 0 : index
    %82 = vector.load %arg8[%c0_40, %c0_41] : memref<128x32xf32, #tpu.memory_space<vmem>>, vector<128x32xf32>
    tpu.vector_store %arg8[%c0_40, %c0_41], %81 {strides = array<i32>} : memref<128x32xf32, #tpu.memory_space<vmem>>, vector<128x32xf32>,
    return
  }
  func.func @transform_0(%arg0: i32) -> (i32, i32) {
    %c0_i32 = arith.constant 0 : i32
    %c0_i32_0 = arith.constant 0 : i32
    return %arg0, %c0_i32 : i32, i32
  }
  func.func @transform_1(%arg0: i32) -> (i32, i32, i32) {
    %c0_i32 = arith.constant 0 : i32
    %c0_i32_0 = arith.constant 0 : i32
    %c0_i32_1 = arith.constant 0 : i32
    return %arg0, %c0_i32, %c0_i32_0 : i32, i32, i32
  }
  func.func @transform_2(%arg0: i32) -> (i32, i32) {
    %c0_i32 = arith.constant 0 : i32
    %c0_i32_0 = arith.constant 0 : i32
    %c0_i32_1 = arith.constant 0 : i32
    return %c0_i32, %c0_i32_0 : i32, i32
  }
  func.func @transform_3(%arg0: i32) -> (i32, i32, i32) {
    %c0_i32 = arith.constant 0 : i32
    %c0_i32_0 = arith.constant 0 : i32
    %c0_i32_1 = arith.constant 0 : i32
    %c0_i32_2 = arith.constant 0 : i32
    return %c0_i32, %c0_i32_0, %c0_i32_1 : i32, i32, i32
  }
  func.func @transform_4(%arg0: i32) -> (i32, i32) {
    %c0_i32 = arith.constant 0 : i32
    %c0_i32_0 = arith.constant 0 : i32
    %c0_i32_1 = arith.constant 0 : i32
    return %c0_i32, %c0_i32_0 : i32, i32
  }
  func.func @transform_5(%arg0: i32) -> (i32, i32) {
    %c0_i32 = arith.constant 0 : i32
    %c0_i32_0 = arith.constant 0 : i32
    %c0_i32_1 = arith.constant 0 : i32
    return %c0_i32, %c0_i32_0 : i32, i32
  }
  func.func @transform_6(%arg0: i32) -> (i32, i32) {
    %c0_i32 = arith.constant 0 : i32
    %c0_i32_0 = arith.constant 0 : i32
    %c0_i32_1 = arith.constant 0 : i32
    return %c0_i32, %c0_i32_0 : i32, i32
  }
  func.func @transform_7(%arg0: i32) -> (i32, i32) {
    %c0_i32 = arith.constant 0 : i32
    %c0_i32_0 = arith.constant 0 : i32
    return %arg0, %c0_i32 : i32, i32
  }
}

</mosaic_0001>

<bundles_post_ra>
// kernel: gnn_forward.1
= control target key start
LH: loop header
LB: loop body
LE: loop exit
PB: predicated region body
PF: predicated region fallthrough
CT: control target
= control target key end

     0   :  { %12 = vsyncpa [#allocation3], 0  ;;  %s3160_s0 = inlined_call_operand.vmem [shape: bf16[1024,19], index: 0, kind: input, shape index: {}]   ;;  %s3161_s1 = inlined_call_operand.vmem [shape: bf16[8,128,128], index: 1, kind: input, shape index: {}]   ;;  %s3162_s2 = inlined_call_operand.hbm [shape: bf16[19,32], index: 2, kind: input, shape index: {}]   ;;  %s3163_s3 = inlined_call_operand.vmem [shape: bf16[6,32,32], index: 3, kind: input, shape index: {}]   ;;  %s3164_s4 = inlined_call_operand.hbm [shape: f32[6,32], index: 4, kind: input, shape index: {}]   ;;  %s3165_s5 = inlined_call_operand.vmem [shape: f32[2,32], index: 5, kind: input, shape index: {}]   ;;  %s3166_s6 = inlined_call_operand.vmem [shape: f32[2,32], index: 6, kind: input, shape index: {}]   ;;  %s3167_s7 = inlined_call_operand.vmem [shape: f32[1024,32], index: 7, kind: output, shape index: {}]  }
   0x1   :  { %13 = vsyncpa [#allocation5], 0  ;;  %s2640_s24 = smov 0  }
   0x2 LB: > { %s2646_s25 = sadd.s32 4294967295, %s2593_s24   ;;  %p2037_p0 = scmp.ge.s32.totalorder %s2593_s24, 1  ;;  %s2593_s24 = sphi %s2640_s24, %s19_s24  }
   0x3   : > { %p207_p1 = scmp.lt.s32.totalorder %s2593_s24, 9  ;;  %s2595_s26 = smov [#allocation2]  }
   0x4   : > { %s219_s27 = sshll.u32 %s2595_s26, 4  ;;  %p2480_p3 = scmp.eq.s32.totalorder %s2646_s25, 0  ;;  %s220_s27 = int_to_ptr.vmem [resolvable:$true] %s219_s27 }
   0x5   : > { %p2650_p2 = pnand %p2037_p0, %p207_p1  ;;  %s2596_s29 = smov [#allocation4]  }
   0x6   : > { %s236_s30 = sshll.u32 %s2596_s29, 4  ;;  %s2538_s9 = scalar_lea.vmem %s220_s27, 192  ;;  %s237_s30 = int_to_ptr.vmem [resolvable:$true] %s236_s30 }
   0x7   : > { %p2473_p4 = pneg %p2650_p2  ;;  %p2539_p7 = scmp.ne.s32.totalorder %s220_s27, %s2538_s9 }
   0x8   : > { %p2546_p10 = scmp.lt.s32.totalorder %s220_s27, %s220_s27  ;;  %p2547_p11 = scmp.lt.s32.totalorder %s2538_s9, %s2538_s9 }
   0x9   : > { %p2659_p5 = pnand %p2480_p3, %p2473_p4 }
   0xa   : > { %p2548_p12 = por %p2547_p11, %p2546_p10 }
   0xb   : > { %p2529_p6 = pneg %p2659_p5 }
   0xd   : > { %p2541_p8 = pnand %p2539_p7, %p2529_p6 }
   0xf   : > { %p2542_p9 = pneg %p2541_p8 }
  0x11   : > { %p2549_p13 = pnand %p2548_p12, %p2542_p9 }
  0x13   : > { %2552 = shalt.err (!%p2549_p13)
}
  0x14   : > { %s2597_s10 = smov 64   ;;  %s2598_s11 = smov 4  }
  0x15   : > { %2476 = dma.hbm_to_vmem [thread:$0]  (!%p2659_p5), %s3162_s2, 192, %s220_s27, [#allocation3], %s2597_s10, %s2597_s10, %s2598_s11  }
  0x16   : > { %s2564_s14 = scalar_lea.vmem %s237_s30, 128  ;;  %p2572_p7 = scmp.lt.s32.totalorder %s237_s30, %s237_s30 }
  0x17   : > { %p2565_p0 = scmp.ne.s32.totalorder %s237_s30, %s2564_s14  ;;  %p2573_p8 = scmp.lt.s32.totalorder %s2564_s14, %s2564_s14 }
  0x19   : > { %p2567_p1 = pnand %p2565_p0, %p2529_p6  ;;  %p2574_p10 = por %p2573_p8, %p2572_p7 }
  0x1b   : > { %p2568_p4 = pneg %p2567_p1 }
  0x1d   : > { %p2575_p9 = pnand %p2574_p10, %p2568_p4 }
  0x1f   : > { %2578 = shalt.err (!%p2575_p9)
}
  0x20   : > { %2479 = dma.hbm_to_vmem [thread:$0]  (!%p2659_p5), %s3164_s4, 128, %s237_s30, [#allocation5]  }
  0x21   : > { %272 = sbr.rel (%p2650_p2) target bundleno = 2038 (0x7f6), region = 48 }
  0x26   : > { %2584 = dma.done.wait (%p2480_p3), [#allocation3], 192  }
  0x27   : > { %2586 = vsyncadd (%p2480_p3), [#allocation3], 4294967104 }
  0x28   : > { %2588 = dma.done.wait (%p2480_p3), [#allocation5], 128  }
  0x29   : > { %2590 = vsyncadd (%p2480_p3), [#allocation5], 4294967168  ;;  %vm424_vm0 = vcmask 1040384   ;;  %s2044_s17 = sshll.u32 %s2646_s25, 4  ;;  %vm425_vm1 = vcmask 1041408   ;;  %v2599_v0 = vmov 65535  }
  0x2a   : > { %p314_p6 = scmp.lt.s32.totalorder %s2044_s17, 127  ;;  %v426_v1 = vsel %vm424_vm0, 4294967295, %v2599_v0  ;;  %vm399_vm2 = vcmask 154624   ;;  %v2497_v3 = vld [vmem:[#allocation2 + $0x8] ss:$0 sps:$4 sm:$0x33]  }
  0x2b   : > { %v427_v2 = vsel %vm425_vm1, %v426_v1, 0  ;;  %v2498_v4 = vld [vmem:[#allocation2] sm:$0xff]   ;;  %p319_p2 = scmp.lt.s32.totalorder %s2646_s25, 7  ;;  %v2515_v15 = vld [vmem:[%s3163_s3 + $0x8] sm:$0xff]   ;;  %v2517_v48 = vld [vmem:[%s3163_s3 + $0x18] sm:$0xff]   ;;  %vm744_vm3 = vcmask 261120  }
  0x2c   : > { %s3171_s17 = smov (!%p314_p6, %s2044_s17), 127  ;;  %v429_v5 = vand.u32 %v2497_v3, %v427_v2  ;;  %v2516_v16 = vld [vmem:[%s3163_s3] sm:$0xff]   ;;  %v2518_v49 = vld [vmem:[%s3163_s3 + $0x10] sm:$0xff]  }
  0x2d   : > { %s2045_s18 = sshll.u32 %s3171_s17, 2  ;;  %s3173_s25 = smov (!%p319_p2, %s2646_s25), 7 }
  0x2e   : > { %s317_s21 = scalar_lea.vmem %s3160_s0, %s2045_s18  ;;  %2261 = vmatprep.subr.bf16.mxu0 %v429_v5  ;;  %s2158_s22 = sshll.u32 %s3173_s25, 6 }
  0x2f   : > { %v2499_v6 = vld [vmem:[%s317_s21] sm:$0xff]   ;;  %2262 = vmatpush3.bf16.msra.mxu0 %v429_v5  ;;  %v2500_v7 = vld [vmem:[%s317_s21 + $0x8] sm:$0xff]   ;;  %v2501_v8 = vld [vmem:[%s317_s21 + $0x10] sm:$0xff]   ;;  %s2711_s27 = scalar_lea.vmem %s3161_s1, %s2158_s22  ;;  %s2049_s11 = sshll.u32 %s3171_s17, 3 }
  0x30   : > { %2265 = vmatprep.mubr.msk.bf16.mxu0 %vm399_vm2, %v2499_v6  ;;  %2263 = vmatprep.subr.bf16.mxu0 %v2498_v4  ;;  %v2502_v9 = vld [vmem:[%s317_s21 + $0x18] sm:$0xff]   ;;  %v2503_v10 = vld [vmem:[%s317_s21 + $0x20] sm:$0xff]   ;;  %v2504_v11 = vld [vmem:[%s317_s21 + $0x28] sm:$0xff]   ;;  %s3079_s14 = scalar_lea.vmem %s3167_s7, %s2049_s11 }
  0x31   : > { %v2505_v12 = vld [vmem:[%s317_s21 + $0x30] sm:$0xff]   ;;  %v2506_v13 = vld [vmem:[%s317_s21 + $0x38] sm:$0xff]   ;;  %v2714_v14 = vld [vmem:[%s2711_s27] sm:$0xff]  }
  0x32   : > { %2297 = vmatprep.mubr.bf16.mxu1 %v2714_v14  ;;  %v2769_v41 = vld [vmem:[%s2711_s27 + $0x8] sm:$0xff]   ;;  %v2772_v42 = vld [vmem:[%s2711_s27 + $0x10] sm:$0xff]   ;;  %v2777_v43 = vld [vmem:[%s2711_s27 + $0x18] sm:$0xff]  }
  0x33   : > { %2264 = vmatpush3.bf16.msra.mxu0 %v2498_v4  ;;  %v2780_v44 = vld [vmem:[%s2711_s27 + $0x20] sm:$0xff]   ;;  %v2785_v45 = vld [vmem:[%s2711_s27 + $0x28] sm:$0xff]   ;;  %v2788_v46 = vld [vmem:[%s2711_s27 + $0x30] sm:$0xff]  }
  0x34   : > { %2313 = vmatprep.subr.bf16.mxu0 %v2515_v15  ;;  %v2793_v47 = vld [vmem:[%s2711_s27 + $0x38] sm:$0xff]  }
  0x36   : > { %2266 = vmatmul.mubr.msk.bf16.vlgmr.msra.gmra.mxu0 %vm399_vm2, %v2500_v7 }
  0x37   : > { %2269 = vmatprep.mubr.msk.bf16.mxu0 %vm399_vm2, %v2501_v8  ;;  %2314 = vmatpush3.bf16.msra.mxu0 %v2515_v15 }
  0x38   : > { %2315 = vmatprep.subr.bf16.mxu0 %v2516_v16 }
  0x3b   : > { %2316 = vmatpush3.bf16.msra.mxu0 %v2516_v16 }
  0x3e   : > { %2270 = vmatmul.mubr.msk.bf16.gmra.mxu0 %vm399_vm2, %v2502_v9 }
  0x3f   : > { %2273 = vmatprep.mubr.msk.bf16.mxu0 %vm399_vm2, %v2503_v10 }
  0x46   : > { %2274 = vmatmul.mubr.msk.bf16.gmra.mxu0 %vm399_vm2, %v2504_v11 }
  0x47   : > { %2277 = vmatprep.mubr.msk.bf16.mxu0 %vm399_vm2, %v2505_v12 }
  0x4e   : > { %2278 = vmatmul.mubr.msk.bf16.gmra.mxu0 %vm399_vm2, %v2506_v13 }
  0xf6   : > { %v2723_v17 = vpop.f32.mrf.mxu0 }
  0xf8   : > { %v2725_v18 = vpop.f32.mrf.mxu0 }
  0xfa   : > { %v2268_v19 = vpop.f32.mrf.mxu0 }
  0xfb   : > { %v548_v39 = vpack.c.bf16 %v2268_v19, %v2723_v17 }
  0xfc   : > { %v2727_v20 = vpop.f32.mrf.mxu0 }
  0xfd   : > { %v547_v40 = vpack.c.bf16 %v2727_v20, %v2725_v18 }
  0xfe   : > { %v2729_v21 = vpop.f32.mrf.mxu0 }
 0x100   : > { %v2731_v22 = vpop.f32.mrf.mxu0 }
 0x102   : > { %v2733_v23 = vpop.f32.mrf.mxu0 }
 0x103   : > { %v550_v37 = vpack.c.bf16 %v2733_v23, %v2729_v21 }
 0x104   : > { %v2735_v24 = vpop.f32.mrf.mxu0 }
 0x105   : > { %v549_v38 = vpack.c.bf16 %v2735_v24, %v2731_v22 }
 0x106   : > { %v2737_v25 = vpop.f32.mrf.mxu0 }
 0x108   : > { %v2739_v26 = vpop.f32.mrf.mxu0 }
 0x10a   : > { %v2741_v27 = vpop.f32.mrf.mxu0 }
 0x10b   : > { %v552_v35 = vpack.c.bf16 %v2741_v27, %v2737_v25 }
 0x10c   : > { %v2743_v28 = vpop.f32.mrf.mxu0 }
 0x10d   : > { %v551_v36 = vpack.c.bf16 %v2743_v28, %v2739_v26 }
 0x10e   : > { %v2745_v29 = vpop.f32.mrf.mxu0 }
 0x110   : > { %v2747_v30 = vpop.f32.mrf.mxu0 }
 0x112   : > { %v2749_v31 = vpop.f32.mrf.mxu0 }
 0x113   : > { %v554_v32 = vpack.c.bf16 %v2749_v31, %v2745_v29 }
 0x114   : > { %v2753_v33 = vpop.f32.mrf.mxu0 }
 0x115   : > { %v553_v34 = vpack.c.bf16 %v2753_v33, %v2747_v30  ;;  %2281 = vmatprep.subr.bf16.mxu1 %v554_v32 }
 0x116   : > { %2282 = vmatpush3.bf16.msra.mxu1 %v554_v32  ;;  %v2836_v32 = vld [vmem:[#allocation4] sm:$0x3f] }
 0x117   : > { %2283 = vmatprep.subr.bf16.mxu1 %v553_v34 }
 0x11a   : > { %2284 = vmatpush3.bf16.msra.mxu1 %v553_v34 }
 0x11b   : > { %2285 = vmatprep.subr.bf16.mxu1 %v552_v35 }
 0x11e   : > { %2286 = vmatpush3.bf16.msra.mxu1 %v552_v35 }
 0x11f   : > { %2287 = vmatprep.subr.bf16.mxu1 %v551_v36 }
 0x122   : > { %2288 = vmatpush3.bf16.msra.mxu1 %v551_v36 }
 0x123   : > { %2289 = vmatprep.subr.bf16.mxu1 %v550_v37 }
 0x126   : > { %2290 = vmatpush3.bf16.msra.mxu1 %v550_v37 }
 0x127   : > { %2291 = vmatprep.subr.bf16.mxu1 %v549_v38 }
 0x12a   : > { %2292 = vmatpush3.bf16.msra.mxu1 %v549_v38 }
 0x12b   : > { %2293 = vmatprep.subr.bf16.mxu1 %v548_v39 }
 0x12e   : > { %2294 = vmatpush3.bf16.msra.mxu1 %v548_v39 }
 0x12f   : > { %2295 = vmatprep.subr.bf16.mxu1 %v547_v40 }
 0x132   : > { %2296 = vmatpush3.bf16.msra.mxu1 %v547_v40 }
 0x133   : > { %2333 = vmatprep.subr.bf16.mxu1 %v2517_v48 }
 0x135   : > { %2298 = vmatmul.mubr.bf16.vlgmr.msra.gmra.mxu1 %v2769_v41 }
 0x136   : > { %2301 = vmatprep.mubr.bf16.mxu1 %v2772_v42  ;;  %2334 = vmatpush3.bf16.msra.mxu1 %v2517_v48 }
 0x137   : > { %2335 = vmatprep.subr.bf16.mxu1 %v2518_v49 }
 0x13a   : > { %2336 = vmatpush3.bf16.msra.mxu1 %v2518_v49 }
 0x13d   : > { %2302 = vmatmul.mubr.bf16.gmra.mxu1 %v2777_v43 }
 0x13e   : > { %2305 = vmatprep.mubr.bf16.mxu1 %v2780_v44 }
 0x145   : > { %2306 = vmatmul.mubr.bf16.gmra.mxu1 %v2785_v45 }
 0x146   : > { %2309 = vmatprep.mubr.bf16.mxu1 %v2788_v46 }
 0x14d   : > { %2310 = vmatmul.mubr.bf16.gmra.mxu1 %v2793_v47 }
 0x1f5   : > { %v2299_v50 = vpop.f32.mrf.mxu1 }
 0x1f6   : > { %v702_v57 = vadd.f32 %v2299_v50, %v2723_v17 }
 0x1f7   : > { %v637_v51 = vpop.f32.mrf.mxu1 }
 0x1f8   : > { %v700_v55 = vadd.f32 %v637_v51, %v2725_v18 }
 0x1f9   : > { %v2300_v52 = vpop.f32.mrf.mxu1 }
 0x1fa   : > { %v703_v53 = vadd.f32 %v2300_v52, %v2268_v19 }
 0x1fb   : > { %v640_v54 = vpop.f32.mrf.mxu1 }
 0x1fc   : > { %v701_v56 = vadd.f32 %v640_v54, %v2727_v20  ;;  %v717_v60 = vpack.c.bf16 %v703_v53, %v702_v57 }
 0x1fd   : > { %v2303_v58 = vpop.f32.mrf.mxu1 }
 0x1fe   : > { %v716_v59 = vpack.c.bf16 %v701_v56, %v700_v55  ;;  %v706_v3 = vadd.f32 %v2303_v58, %v2729_v21 }
 0x1ff   : > { %v653_v61 = vpop.f32.mrf.mxu1 }
 0x200   : > { %2317 = vmatprep.mubr.msk.bf16.mxu0 %vm744_vm3, %v716_v59  ;;  %v704_v1 = vadd.f32 %v653_v61, %v2731_v22 }
 0x201   : > { %v2304_v62 = vpop.f32.mrf.mxu1  ;;  %2318 = vmatmul.mubr.msk.bf16.vlgmr.msra.gmra.mxu0 %vm744_vm3, %v717_v60 }
 0x202   : > { %v707_v63 = vadd.f32 %v2304_v62, %v2733_v23 }
 0x203   : > { %v656_v0 = vpop.f32.mrf.mxu1 }
 0x204   : > { %v705_v2 = vadd.f32 %v656_v0, %v2735_v24  ;;  %v719_v6 = vpack.c.bf16 %v707_v63, %v706_v3 }
 0x205   : > { %v2307_v4 = vpop.f32.mrf.mxu1 }
 0x206   : > { %v718_v5 = vpack.c.bf16 %v705_v2, %v704_v1  ;;  %v710_v13 = vadd.f32 %v2307_v4, %v2737_v25 }
 0x207   : > { %v669_v7 = vpop.f32.mrf.mxu1 }
 0x208   : > { %2321 = vmatprep.mubr.msk.bf16.mxu0 %vm744_vm3, %v718_v5  ;;  %v708_v11 = vadd.f32 %v669_v7, %v2739_v26 }
 0x209   : > { %v2308_v8 = vpop.f32.mrf.mxu1  ;;  %2322 = vmatmul.mubr.msk.bf16.gmra.mxu0 %vm744_vm3, %v719_v6 }
 0x20a   : > { %v711_v9 = vadd.f32 %v2308_v8, %v2741_v27  ;;  %v2519_v27 = vld [vmem:[%s3163_s3 + $0x28] sm:$0xff]  }
 0x20b   : > { %v672_v10 = vpop.f32.mrf.mxu1  ;;  %2353 = vmatprep.subr.bf16.mxu0 %v2519_v27 }
 0x20c   : > { %v709_v12 = vadd.f32 %v672_v10, %v2743_v28  ;;  %v721_v17 = vpack.c.bf16 %v711_v9, %v710_v13  ;;  %v2520_v28 = vld [vmem:[%s3163_s3 + $0x20] sm:$0xff]   ;;  %2354 = vmatpush3.bf16.msra.mxu0 %v2519_v27 }
 0x20d   : > { %v2311_v15 = vpop.f32.mrf.mxu1  ;;  %2355 = vmatprep.subr.bf16.mxu0 %v2520_v28 }
 0x20e   : > { %v720_v16 = vpack.c.bf16 %v709_v12, %v708_v11  ;;  %v714_v24 = vadd.f32 %v2311_v15, %v2745_v29 }
 0x20f   : > { %v685_v18 = vpop.f32.mrf.mxu1 }
 0x210   : > { %2325 = vmatprep.mubr.msk.bf16.mxu0 %vm744_vm3, %v720_v16  ;;  %v712_v22 = vadd.f32 %v685_v18, %v2747_v30  ;;  %2356 = vmatpush3.bf16.msra.mxu0 %v2520_v28  ;;  %v728_v30 = vlaneseq }
 0x211   : > { %v2312_v19 = vpop.f32.mrf.mxu1  ;;  %2326 = vmatmul.mubr.msk.bf16.gmra.mxu0 %vm744_vm3, %v721_v17 }
 0x212   : > { %v715_v20 = vadd.f32 %v2312_v19, %v2749_v31  ;;  %v2831_v29 = vshrl.u32 %v728_v30, 7 }
 0x213   : > { %v688_v21 = vpop.f32.mrf.mxu1 }
 0x214   : > { %v713_v23 = vadd.f32 %v688_v21, %v2753_v33  ;;  %v723_v25 = vpack.c.bf16 %v715_v20, %v714_v24  ;;  %v2834_v31 = vsub.s32 0, %v2831_v29 }
 0x216   : > { %v722_v26 = vpack.c.bf16 %v713_v23, %v712_v22  ;;  %v731_v34 = vrot.slane %v2836_v32, %v2834_v31 }
 0x218   : > { %2329 = vmatprep.mubr.msk.bf16.mxu0 %vm744_vm3, %v722_v26 }
 0x219   : > { %2330 = vmatmul.mubr.msk.bf16.gmra.mxu0 %vm744_vm3, %v723_v25 }
 0x2c1   : > { %v2319_v33 = vpop.f32.mrf.mxu0 }
 0x2c2   : > { %v812_v39 = vadd.f32 %v2319_v33, %v731_v34 }
 0x2c3   : > { %v803_v35 = vpop.f32.mrf.mxu0 }
 0x2c4   : > { %v804_v37 = vadd.f32 %v803_v35, %v731_v34  ;;  %v868_v53 = vmax.f32 %v812_v39, 0.0 }
 0x2c5   : > { %v2320_v36 = vpop.f32.mrf.mxu0 }
 0x2c6   : > { %v815_v38 = vadd.f32 %v2320_v36, %v731_v34  ;;  %v866_v51 = vmax.f32 %v804_v37, 0.0 }
 0x2c7   : > { %v806_v40 = vpop.f32.mrf.mxu0 }
 0x2c8   : > { %v807_v48 = vadd.f32 %v806_v40, %v731_v34  ;;  %v869_v49 = vmax.f32 %v815_v38, 0.0  ;;  %v2850_v38 = vsub.s32 1, %v2831_v29 }
 0x2c9   : > { %v2323_v50 = vpop.f32.mrf.mxu0 }
 0x2ca   : > { %v867_v52 = vmax.f32 %v807_v48, 0.0  ;;  %v883_v56 = vpack.c.bf16 %v869_v49, %v868_v53  ;;  %v828_v60 = vadd.f32 %v2323_v50, %v731_v34  ;;  %v898_v40 = vrot.slane %v2836_v32, %v2850_v38 }
 0x2cb   : > { %v819_v54 = vpop.f32.mrf.mxu0 }
 0x2cc   : > { %v882_v55 = vpack.c.bf16 %v867_v52, %v866_v51  ;;  %v820_v58 = vadd.f32 %v819_v54, %v731_v34  ;;  %v872_v3 = vmax.f32 %v828_v60, 0.0 }
 0x2cd   : > { %v2324_v57 = vpop.f32.mrf.mxu0 }
 0x2ce   : > { %v831_v59 = vadd.f32 %v2324_v57, %v731_v34  ;;  %2337 = vmatprep.mubr.msk.bf16.mxu1 %vm744_vm3, %v882_v55  ;;  %v870_v1 = vmax.f32 %v820_v58, 0.0 }
 0x2cf   : > { %v822_v61 = vpop.f32.mrf.mxu0  ;;  %2338 = vmatmul.mubr.msk.bf16.vlgmr.msra.gmra.mxu1 %vm744_vm3, %v883_v56 }
 0x2d0   : > { %v823_v62 = vadd.f32 %v822_v61, %v731_v34  ;;  %v873_v63 = vmax.f32 %v831_v59, 0.0 }
 0x2d1   : > { %v2327_v0 = vpop.f32.mrf.mxu0 }
 0x2d2   : > { %v871_v2 = vmax.f32 %v823_v62, 0.0  ;;  %v885_v6 = vpack.c.bf16 %v873_v63, %v872_v3  ;;  %v844_v10 = vadd.f32 %v2327_v0, %v731_v34 }
 0x2d3   : > { %v835_v4 = vpop.f32.mrf.mxu0 }
 0x2d4   : > { %v884_v5 = vpack.c.bf16 %v871_v2, %v870_v1  ;;  %v836_v8 = vadd.f32 %v835_v4, %v731_v34  ;;  %v876_v18 = vmax.f32 %v844_v10, 0.0 }
 0x2d5   : > { %v2328_v7 = vpop.f32.mrf.mxu0 }
 0x2d6   : > { %v847_v9 = vadd.f32 %v2328_v7, %v731_v34  ;;  %2341 = vmatprep.mubr.msk.bf16.mxu1 %vm744_vm3, %v884_v5  ;;  %v874_v16 = vmax.f32 %v836_v8, 0.0 }
 0x2d7   : > { %v838_v11 = vpop.f32.mrf.mxu0  ;;  %2342 = vmatmul.mubr.msk.bf16.gmra.mxu1 %vm744_vm3, %v885_v6 }
 0x2d8   : > { %v839_v12 = vadd.f32 %v838_v11, %v731_v34  ;;  %v877_v13 = vmax.f32 %v847_v9, 0.0 }
 0x2d9   : > { %v2331_v15 = vpop.f32.mrf.mxu0 }
 0x2da   : > { %v875_v17 = vmax.f32 %v839_v12, 0.0  ;;  %v887_v21 = vpack.c.bf16 %v877_v13, %v876_v18  ;;  %v860_v26 = vadd.f32 %v2331_v15, %v731_v34 }
 0x2db   : > { %v851_v19 = vpop.f32.mrf.mxu0 }
 0x2dc   : > { %v886_v20 = vpack.c.bf16 %v875_v17, %v874_v16  ;;  %v852_v23 = vadd.f32 %v851_v19, %v731_v34  ;;  %v880_v35 = vmax.f32 %v860_v26, 0.0 }
 0x2dd   : > { %v2332_v22 = vpop.f32.mrf.mxu0 }
 0x2de   : > { %v863_v24 = vadd.f32 %v2332_v22, %v731_v34  ;;  %2345 = vmatprep.mubr.msk.bf16.mxu1 %vm744_vm3, %v886_v20  ;;  %v878_v30 = vmax.f32 %v852_v23, 0.0 }
 0x2df   : > { %v854_v25 = vpop.f32.mrf.mxu0  ;;  %2346 = vmatmul.mubr.msk.bf16.gmra.mxu1 %vm744_vm3, %v887_v21 }
 0x2e0   : > { %v855_v27 = vadd.f32 %v854_v25, %v731_v34  ;;  %v881_v28 = vmax.f32 %v863_v24, 0.0 }
 0x2e2   : > { %v879_v33 = vmax.f32 %v855_v27, 0.0  ;;  %v889_v37 = vpack.c.bf16 %v881_v28, %v880_v35 }
 0x2e4   : > { %v888_v36 = vpack.c.bf16 %v879_v33, %v878_v30 }
 0x2e6   : > { %2349 = vmatprep.mubr.msk.bf16.mxu1 %vm744_vm3, %v888_v36 }
 0x2e7   : > { %2350 = vmatmul.mubr.msk.bf16.gmra.mxu1 %vm744_vm3, %v889_v37 }
 0x2e8   : > { %2389 = vmatprep.mubr.bf16.mxu1 %v2714_v14 }
 0x38f   : > { %v2339_v39 = vpop.f32.mrf.mxu1 }
 0x390   : > { %v978_v51 = vadd.f32 %v2339_v39, %v898_v40 }
 0x391   : > { %v969_v34 = vpop.f32.mrf.mxu1 }
 0x392   : > { %v970_v49 = vadd.f32 %v969_v34, %v898_v40  ;;  %v1034_v58 = vmax.f32 %v978_v51, 0.0  ;;  %v2522_v51 = vld [vmem:[%s3163_s3 + $0x30] sm:$0xff]  }
 0x393   : > { %v2340_v48 = vpop.f32.mrf.mxu1 }
 0x394   : > { %v981_v50 = vadd.f32 %v2340_v48, %v898_v40  ;;  %v1032_v56 = vmax.f32 %v970_v49, 0.0 }
 0x395   : > { %v972_v52 = vpop.f32.mrf.mxu1 }
 0x396   : > { %v973_v53 = vadd.f32 %v972_v52, %v898_v40  ;;  %v1035_v54 = vmax.f32 %v981_v50, 0.0  ;;  %v2521_v50 = vld [vmem:[%s3163_s3 + $0x38] sm:$0xff]  }
 0x397   : > { %v2343_v55 = vpop.f32.mrf.mxu1  ;;  %2405 = vmatprep.subr.bf16.mxu0 %v2521_v50 }
 0x398   : > { %v1033_v57 = vmax.f32 %v973_v53, 0.0  ;;  %v1049_v60 = vpack.c.bf16 %v1035_v54, %v1034_v58  ;;  %v994_v0 = vadd.f32 %v2343_v55, %v898_v40 }
 0x399   : > { %v985_v14 = vpop.f32.mrf.mxu1 }
 0x39a   : > { %v1048_v59 = vpack.c.bf16 %v1033_v57, %v1032_v56  ;;  %v986_v62 = vadd.f32 %v985_v14, %v898_v40  ;;  %v1038_v7 = vmax.f32 %v994_v0, 0.0 }
 0x39b   : > { %v2344_v61 = vpop.f32.mrf.mxu1 }
 0x39c   : > { %v997_v63 = vadd.f32 %v2344_v61, %v898_v40  ;;  %2357 = vmatprep.mubr.msk.bf16.mxu0 %vm744_vm3, %v1048_v59  ;;  %v1036_v5 = vmax.f32 %v986_v62, 0.0 }
 0x39d   : > { %v988_v1 = vpop.f32.mrf.mxu1  ;;  %2358 = vmatmul.mubr.msk.bf16.vlgmr.msra.gmra.mxu0 %vm744_vm3, %v1049_v60  ;;  %v1063_v60 = vsub.s32 2, %v2831_v29 }
 0x39e   : > { %v989_v2 = vadd.f32 %v988_v1, %v898_v40  ;;  %v1039_v3 = vmax.f32 %v997_v63, 0.0  ;;  %2406 = vmatpush3.bf16.msra.mxu0 %v2521_v50  ;;  %v2881_v1 = vld [vmem:[%s3165_s5] sm:$0x3] }
 0x39f   : > { %v2347_v4 = vpop.f32.mrf.mxu1  ;;  %2407 = vmatprep.subr.bf16.mxu0 %v2522_v51  ;;  %v2876_v63 = vrot.slane %v2836_v32, %v1063_v60 }
 0x3a0   : > { %v1037_v6 = vmax.f32 %v989_v2, 0.0  ;;  %v1051_v10 = vpack.c.bf16 %v1039_v3, %v1038_v7  ;;  %v1010_v15 = vadd.f32 %v2347_v4, %v898_v40  ;;  %v2888_v7 = vrot.slane %v2881_v1, %v2834_v31 }
 0x3a1   : > { %v1001_v8 = vpop.f32.mrf.mxu1 }
 0x3a2   : > { %v1050_v9 = vpack.c.bf16 %v1037_v6, %v1036_v5  ;;  %v1002_v12 = vadd.f32 %v1001_v8, %v898_v40  ;;  %v1042_v22 = vmax.f32 %v1010_v15, 0.0  ;;  %2408 = vmatpush3.bf16.msra.mxu0 %v2522_v51 }
 0x3a3   : > { %v2348_v11 = vpop.f32.mrf.mxu1 }
 0x3a4   : > { %v1013_v13 = vadd.f32 %v2348_v11, %v898_v40  ;;  %2361 = vmatprep.mubr.msk.bf16.mxu0 %vm744_vm3, %v1050_v9  ;;  %v1040_v20 = vmax.f32 %v1002_v12, 0.0 }
 0x3a5   : > { %v1004_v16 = vpop.f32.mrf.mxu1  ;;  %2362 = vmatmul.mubr.msk.bf16.gmra.mxu0 %vm744_vm3, %v1051_v10  ;;  %v2894_v10 = vld [vmem:[%s3166_s6] sm:$0x3] }
 0x3a6   : > { %v1005_v17 = vadd.f32 %v1004_v16, %v898_v40  ;;  %v1043_v18 = vmax.f32 %v1013_v13, 0.0 }
 0x3a7   : > { %v2351_v19 = vpop.f32.mrf.mxu1 }
 0x3a8   : > { %v1041_v21 = vmax.f32 %v1005_v17, 0.0  ;;  %v1053_v26 = vpack.c.bf16 %v1043_v18, %v1042_v22  ;;  %v1026_v30 = vadd.f32 %v2351_v19, %v898_v40 }
 0x3a9   : > { %v1017_v23 = vpop.f32.mrf.mxu1 }
 0x3aa   : > { %v1052_v24 = vpack.c.bf16 %v1041_v21, %v1040_v20  ;;  %v1018_v27 = vadd.f32 %v1017_v23, %v898_v40  ;;  %v1046_v34 = vmax.f32 %v1026_v30, 0.0  ;;  %v2903_v20 = vrot.slane %v2894_v10, %v2834_v31 }
 0x3ab   : > { %v2352_v25 = vpop.f32.mrf.mxu1 }
 0x3ac   : > { %v1029_v28 = vadd.f32 %v2352_v25, %v898_v40  ;;  %2365 = vmatprep.mubr.msk.bf16.mxu0 %vm744_vm3, %v1052_v24  ;;  %v1044_v37 = vmax.f32 %v1018_v27, 0.0 }
 0x3ad   : > { %v1020_v33 = vpop.f32.mrf.mxu1  ;;  %2366 = vmatmul.mubr.msk.bf16.gmra.mxu0 %vm744_vm3, %v1053_v26 }
 0x3ae   : > { %v1021_v35 = vadd.f32 %v1020_v33, %v898_v40  ;;  %v1047_v36 = vmax.f32 %v1029_v28, 0.0 }
 0x3b0   : > { %v1045_v39 = vmax.f32 %v1021_v35, 0.0  ;;  %v1055_v49 = vpack.c.bf16 %v1047_v36, %v1046_v34 }
 0x3b2   : > { %v1054_v48 = vpack.c.bf16 %v1045_v39, %v1044_v37 }
 0x3b4   : > { %2369 = vmatprep.mubr.msk.bf16.mxu0 %vm744_vm3, %v1054_v48 }
 0x3b5   : > { %2370 = vmatmul.mubr.msk.bf16.gmra.mxu0 %vm744_vm3, %v1055_v49 }
 0x45d   : > { %v2868_v40 = vpop.f32.mrf.mxu0 }
 0x45f   : > { %v2870_v52 = vpop.f32.mrf.mxu0 }
 0x461   : > { %v2360_v53 = vpop.f32.mrf.mxu0 }
 0x463   : > { %v2872_v54 = vpop.f32.mrf.mxu0 }
 0x465   : > { %v2363_v55 = vpop.f32.mrf.mxu0 }
 0x466   : > { %v1160_v35 = vadd.f32 %v2363_v55, %v2876_v63 }
 0x467   : > { %v1151_v56 = vpop.f32.mrf.mxu0 }
 0x469   : > { %v2364_v57 = vpop.f32.mrf.mxu0 }
 0x46a   : > { %v1163_v24 = vadd.f32 %v2364_v57, %v2876_v63 }
 0x46b   : > { %v1154_v58 = vpop.f32.mrf.mxu0 }
 0x46c   : > { %v1205_v34 = vmax.f32 %v1163_v24, 0.0  ;;  %v1155_v48 = vadd.f32 %v1154_v58, %v2876_v63 }
 0x46d   : > { %v2367_v14 = vpop.f32.mrf.mxu0 }
 0x46e   : > { %v1176_v8 = vadd.f32 %v2367_v14, %v2876_v63  ;;  %v1152_v14 = vadd.f32 %v1151_v56, %v2876_v63 }
 0x46f   : > { %v1167_v59 = vpop.f32.mrf.mxu0 }
 0x470   : > { %v1208_v21 = vmax.f32 %v1176_v8, 0.0  ;;  %v1168_v22 = vadd.f32 %v1167_v59, %v2876_v63  ;;  %v1144_v8 = vadd.f32 %v2868_v40, %v2876_v63 }
 0x471   : > { %v2368_v61 = vpop.f32.mrf.mxu0 }
 0x472   : > { %v1179_v3 = vadd.f32 %v2368_v61, %v2876_v63  ;;  %v1228_v36 = vmul.f32 %v2888_v7, %v1208_v21  ;;  %v1206_v37 = vmax.f32 %v1168_v22, 0.0  ;;  %v1204_v61 = vmax.f32 %v1160_v35, 0.0 }
 0x473   : > { %v1170_v62 = vpop.f32.mrf.mxu0  ;;  %v1136_v21 = vadd.f32 %v2870_v52, %v2876_v63 }
 0x474   : > { %v1209_v12 = vmax.f32 %v1179_v3, 0.0  ;;  %v1171_v13 = vadd.f32 %v1170_v62, %v2876_v63  ;;  %v2935_v58 = vadd.f32 %v2903_v20, %v1228_v36  ;;  %v1226_v62 = vmul.f32 %v2888_v7, %v1206_v37 }
 0x475   : > { %v2371_v0 = vpop.f32.mrf.mxu0  ;;  %v1225_v3 = vmul.f32 %v2888_v7, %v1205_v34 }
 0x476   : > { %v1192_v2 = vadd.f32 %v2371_v0, %v2876_v63  ;;  %v1229_v25 = vmul.f32 %v2888_v7, %v1209_v12  ;;  %v1207_v27 = vmax.f32 %v1171_v13, 0.0  ;;  %v2957_v12 = vadd.f32 %v2903_v20, %v1226_v62 }
 0x477   : > { %v1183_v4 = vpop.f32.mrf.mxu0 }
 0x478   : > { %v1212_v5 = vmax.f32 %v1192_v2, 0.0  ;;  %v1184_v6 = vadd.f32 %v1183_v4, %v2876_v63  ;;  %v2926_v50 = vadd.f32 %v2903_v20, %v1229_v25  ;;  %v1227_v51 = vmul.f32 %v2888_v7, %v1207_v27 }
 0x479   : > { %v2372_v9 = vpop.f32.mrf.mxu0  ;;  %v1147_v2 = vadd.f32 %v2360_v53, %v2876_v63  ;;  %v1203_v4 = vmax.f32 %v1155_v48, 0.0  ;;  %v1224_v53 = vmul.f32 %v2888_v7, %v1204_v61 }
 0x47a   : > { %v1210_v11 = vmax.f32 %v1184_v6, 0.0  ;;  %v1232_v15 = vmul.f32 %v2888_v7, %v1212_v5  ;;  %v1195_v16 = vadd.f32 %v2372_v9, %v2876_v63  ;;  %v1265_v5 = vmax.f32 %v2926_v50, 0.0 }
 0x47b   : > { %v1186_v17 = vpop.f32.mrf.mxu0  ;;  %v2950_v6 = vadd.f32 %v2903_v20, %v1227_v51  ;;  %v1202_v9 = vmax.f32 %v1152_v14, 0.0  ;;  %v1201_v13 = vmax.f32 %v1147_v2, 0.0  ;;  %v2973_v22 = vadd.f32 %v2903_v20, %v1224_v53 }
 0x47c   : > { %v1230_v18 = vmul.f32 %v2888_v7, %v1210_v11  ;;  %v1187_v19 = vadd.f32 %v1186_v17, %v2876_v63  ;;  %v1213_v23 = vmax.f32 %v1195_v16, 0.0  ;;  %v2909_v28 = vadd.f32 %v2903_v20, %v1232_v15 }
 0x47d   : > { %v1264_v11 = vmax.f32 %v2935_v58, 0.0  ;;  %v1139_v15 = vadd.f32 %v2872_v54, %v2876_v63  ;;  %v2962_v16 = vadd.f32 %v2903_v20, %v1225_v3  ;;  %v1223_v17 = vmul.f32 %v2888_v7, %v1203_v4 }
 0x47e   : > { %v1211_v26 = vmax.f32 %v1187_v19, 0.0  ;;  %v1233_v30 = vmul.f32 %v2888_v7, %v1213_v23  ;;  %v2913_v33 = vadd.f32 %v2903_v20, %v1230_v18  ;;  %v1268_v57 = vmax.f32 %v2909_v28, 0.0 }
 0x47f   : > { %v1263_v40 = vmax.f32 %v2950_v6, 0.0  ;;  %v1275_v18 = vpack.c.bf16 %v1265_v5, %v1264_v11  ;;  %v1200_v19 = vmax.f32 %v1144_v8, 0.0  ;;  %v1222_v54 = vmul.f32 %v2888_v7, %v1202_v9 }
 0x480   : > { %v1231_v31 = vmul.f32 %v2888_v7, %v1211_v26  ;;  %v2919_v39 = vadd.f32 %v2903_v20, %v1233_v30  ;;  %v1266_v59 = vmax.f32 %v2913_v33, 0.0  ;;  %v1262_v23 = vmax.f32 %v2957_v12, 0.0  ;;  %v2526_v33 = vld [vmem:[%s3163_s3 + $0x50] sm:$0xff]  }
 0x481   : > { %v1221_v24 = vmul.f32 %v2888_v7, %v1201_v13  ;;  %v1199_v26 = vmax.f32 %v1139_v15, 0.0  ;;  %v1261_v25 = vmax.f32 %v2962_v16, 0.0  ;;  %v2980_v27 = vadd.f32 %v2903_v20, %v1223_v17 }
 0x482   : > { %v2923_v49 = vadd.f32 %v2903_v20, %v1231_v31  ;;  %v1269_v55 = vmax.f32 %v2919_v39, 0.0  ;;  %v1274_v52 = vpack.c.bf16 %v1263_v40, %v1262_v23  ;;  %v1220_v63 = vmul.f32 %v2888_v7, %v1200_v19  ;;  %v2525_v39 = vld [vmem:[%s3163_s3 + $0x58] sm:$0xff]  }
 0x483   : > { %v1198_v30 = vmax.f32 %v1136_v21, 0.0  ;;  %v1260_v31 = vmax.f32 %v2973_v22, 0.0  ;;  %v1242_v35 = vadd.f32 %v2903_v20, %v1222_v54  ;;  %v1241_v36 = vadd.f32 %v2903_v20, %v1221_v24  ;;  %2445 = vmatprep.subr.bf16.mxu0 %v2525_v39 }
 0x484   : > { %v1267_v60 = vmax.f32 %v2923_v49, 0.0  ;;  %v1277_v0 = vpack.c.bf16 %v1269_v55, %v1268_v57  ;;  %v1219_v37 = vmul.f32 %v2888_v7, %v1199_v26  ;;  %v1259_v34 = vmax.f32 %v2980_v27, 0.0 }
 0x485   : > { %v1273_v48 = vpack.c.bf16 %v1261_v25, %v1260_v31  ;;  %v1240_v51 = vadd.f32 %v2903_v20, %v1220_v63  ;;  %v1218_v14 = vmul.f32 %v2888_v7, %v1198_v30  ;;  %v1258_v61 = vmax.f32 %v1242_v35, 0.0  ;;  %v2523_v7 = vld [vmem:[%s3163_s3 + $0x48] sm:$0xff]  }
 0x486   : > { %v1276_v56 = vpack.c.bf16 %v1267_v60, %v1266_v59  ;;  %2373 = vmatprep.subr.bf16.mxu1 %v1277_v0  ;;  %v1257_v62 = vmax.f32 %v1241_v36, 0.0  ;;  %v1406_v28 = vsub.s32 3, %v2831_v29 }
 0x487   : > { %2374 = vmatpush3.bf16.msra.mxu1 %v1277_v0  ;;  %v1239_v0 = vadd.f32 %v2903_v20, %v1219_v37  ;;  %v1272_v2 = vpack.c.bf16 %v1259_v34, %v1258_v61  ;;  %v1238_v3 = vadd.f32 %v2903_v20, %v1218_v14 }
 0x488   : > { %2375 = vmatprep.subr.bf16.mxu1 %v1276_v56 }
 0x489   : > { %v1255_v4 = vmax.f32 %v1239_v0, 0.0  ;;  %v1254_v53 = vmax.f32 %v1238_v3, 0.0 }
 0x48b   : > { %2376 = vmatpush3.bf16.msra.mxu1 %v1276_v56  ;;  %v1256_v56 = vmax.f32 %v1240_v51, 0.0  ;;  %v1270_v9 = vpack.c.bf16 %v1255_v4, %v1254_v53 }
 0x48c   : > { %2377 = vmatprep.subr.bf16.mxu1 %v1275_v18 }
 0x48d   : > { %v1271_v8 = vpack.c.bf16 %v1257_v62, %v1256_v56 }
 0x48f   : > { %2378 = vmatpush3.bf16.msra.mxu1 %v1275_v18 }
 0x490   : > { %2379 = vmatprep.subr.bf16.mxu1 %v1274_v52 }
 0x493   : > { %2380 = vmatpush3.bf16.msra.mxu1 %v1274_v52 }
 0x494   : > { %2381 = vmatprep.subr.bf16.mxu1 %v1273_v48 }
 0x497   : > { %2382 = vmatpush3.bf16.msra.mxu1 %v1273_v48 }
 0x498   : > { %2383 = vmatprep.subr.bf16.mxu1 %v1272_v2 }
 0x49b   : > { %2384 = vmatpush3.bf16.msra.mxu1 %v1272_v2 }
 0x49c   : > { %2385 = vmatprep.subr.bf16.mxu1 %v1271_v8 }
 0x49f   : > { %2386 = vmatpush3.bf16.msra.mxu1 %v1271_v8 }
 0x4a0   : > { %2387 = vmatprep.subr.bf16.mxu1 %v1270_v9 }
 0x4a3   : > { %2388 = vmatpush3.bf16.msra.mxu1 %v1270_v9 }
 0x4a4   : > { %2425 = vmatprep.subr.bf16.mxu1 %v2523_v7 }
 0x4a6   : > { %2390 = vmatmul.mubr.bf16.vlgmr.msra.gmra.mxu1 %v2769_v41  ;;  %v2524_v41 = vld [vmem:[%s3163_s3 + $0x40] sm:$0xff]  }
 0x4a7   : > { %2393 = vmatprep.mubr.bf16.mxu1 %v2772_v42  ;;  %2426 = vmatpush3.bf16.msra.mxu1 %v2523_v7 }
 0x4a8   : > { %2427 = vmatprep.subr.bf16.mxu1 %v2524_v41 }
 0x4ab   : > { %2428 = vmatpush3.bf16.msra.mxu1 %v2524_v41 }
 0x4ae   : > { %2394 = vmatmul.mubr.bf16.gmra.mxu1 %v2777_v43 }
 0x4af   : > { %2397 = vmatprep.mubr.bf16.mxu1 %v2780_v44 }
 0x4b6   : > { %2398 = vmatmul.mubr.bf16.gmra.mxu1 %v2785_v45 }
 0x4b7   : > { %2401 = vmatprep.mubr.bf16.mxu1 %v2788_v46 }
 0x4be   : > { %2402 = vmatmul.mubr.bf16.gmra.mxu1 %v2793_v47 }
 0x566   : > { %v2391_v42 = vpop.f32.mrf.mxu1 }
 0x567   : > { %v1377_v47 = vadd.f32 %v2391_v42, %v1256_v56 }
 0x568   : > { %v1312_v43 = vpop.f32.mrf.mxu1 }
 0x569   : > { %v1375_v46 = vadd.f32 %v1312_v43, %v1254_v53 }
 0x56a   : > { %v2392_v44 = vpop.f32.mrf.mxu1 }
 0x56b   : > { %v1378_v45 = vadd.f32 %v2392_v44, %v1257_v62 }
 0x56c   : > { %v1315_v20 = vpop.f32.mrf.mxu1 }
 0x56d   : > { %v1376_v13 = vadd.f32 %v1315_v20, %v1255_v4  ;;  %v1392_v17 = vpack.c.bf16 %v1378_v45, %v1377_v47 }
 0x56e   : > { %v2395_v15 = vpop.f32.mrf.mxu1 }
 0x56f   : > { %v1391_v16 = vpack.c.bf16 %v1376_v13, %v1375_v46  ;;  %v1381_v26 = vadd.f32 %v2395_v15, %v1260_v31 }
 0x570   : > { %v1328_v18 = vpop.f32.mrf.mxu1 }
 0x571   : > { %2409 = vmatprep.mubr.msk.bf16.mxu0 %vm744_vm3, %v1391_v16  ;;  %v1379_v54 = vadd.f32 %v1328_v18, %v1258_v61 }
 0x572   : > { %v2396_v19 = vpop.f32.mrf.mxu1  ;;  %2410 = vmatmul.mubr.msk.bf16.vlgmr.msra.gmra.mxu0 %vm744_vm3, %v1392_v17 }
 0x573   : > { %v1382_v21 = vadd.f32 %v2396_v19, %v1261_v25  ;;  %2446 = vmatpush3.bf16.msra.mxu0 %v2525_v39 }
 0x574   : > { %v1331_v22 = vpop.f32.mrf.mxu1  ;;  %2447 = vmatprep.subr.bf16.mxu0 %v2526_v33 }
 0x575   : > { %v1380_v24 = vadd.f32 %v1331_v22, %v1259_v34  ;;  %v1394_v63 = vpack.c.bf16 %v1382_v21, %v1381_v26 }
 0x576   : > { %v2399_v27 = vpop.f32.mrf.mxu1 }
 0x577   : > { %v1393_v52 = vpack.c.bf16 %v1380_v24, %v1379_v54  ;;  %v1385_v31 = vadd.f32 %v2399_v27, %v1264_v11  ;;  %2448 = vmatpush3.bf16.msra.mxu0 %v2526_v33  ;;  %v1572_v33 = vsub.s32 4, %v2831_v29 }
 0x578   : > { %v1344_v30 = vpop.f32.mrf.mxu1 }
 0x579   : > { %2413 = vmatprep.mubr.msk.bf16.mxu0 %vm744_vm3, %v1393_v52  ;;  %v1383_v25 = vadd.f32 %v1344_v30, %v1262_v23 }
 0x57a   : > { %v2400_v35 = vpop.f32.mrf.mxu1  ;;  %2414 = vmatmul.mubr.msk.bf16.gmra.mxu0 %vm744_vm3, %v1394_v63 }
 0x57b   : > { %v1386_v36 = vadd.f32 %v2400_v35, %v1265_v5 }
 0x57c   : > { %v1347_v37 = vpop.f32.mrf.mxu1 }
 0x57d   : > { %v1384_v34 = vadd.f32 %v1347_v37, %v1263_v40  ;;  %v1396_v14 = vpack.c.bf16 %v1386_v36, %v1385_v31 }
 0x57e   : > { %v2403_v48 = vpop.f32.mrf.mxu1 }
 0x57f   : > { %v1395_v51 = vpack.c.bf16 %v1384_v34, %v1383_v25  ;;  %v1389_v11 = vadd.f32 %v2403_v48, %v1268_v57  ;;  %v1407_v57 = vrot.slane %v2836_v32, %v1406_v28 }
 0x580   : > { %v1360_v61 = vpop.f32.mrf.mxu1 }
 0x581   : > { %2417 = vmatprep.mubr.msk.bf16.mxu0 %vm744_vm3, %v1395_v51  ;;  %v1387_v6 = vadd.f32 %v1360_v61, %v1266_v59 }
 0x582   : > { %v2404_v62 = vpop.f32.mrf.mxu1  ;;  %2418 = vmatmul.mubr.msk.bf16.gmra.mxu0 %vm744_vm3, %v1396_v14 }
 0x583   : > { %v1390_v50 = vadd.f32 %v2404_v62, %v1269_v55 }
 0x584   : > { %v1363_v5 = vpop.f32.mrf.mxu1 }
 0x585   : > { %v1388_v58 = vadd.f32 %v1363_v5, %v1267_v60  ;;  %v1398_v40 = vpack.c.bf16 %v1390_v50, %v1389_v11 }
 0x587   : > { %v1397_v12 = vpack.c.bf16 %v1388_v58, %v1387_v6 }
 0x589   : > { %2421 = vmatprep.mubr.msk.bf16.mxu0 %vm744_vm3, %v1397_v12 }
 0x58a   : > { %2422 = vmatmul.mubr.msk.bf16.gmra.mxu0 %vm744_vm3, %v1398_v40 }
 0x632   : > { %v2411_v49 = vpop.f32.mrf.mxu0 }
 0x633   : > { %v1487_v0 = vadd.f32 %v2411_v49, %v1407_v57  ;;  %v1573_v49 = vrot.slane %v2836_v32, %v1572_v33 }
 0x634   : > { %v1478_v55 = vpop.f32.mrf.mxu0 }
 0x635   : > { %v1479_v60 = vadd.f32 %v1478_v55, %v1407_v57  ;;  %v1543_v9 = vmax.f32 %v1487_v0, 0.0 }
 0x636   : > { %v2412_v59 = vpop.f32.mrf.mxu0 }
 0x637   : > { %v1490_v23 = vadd.f32 %v2412_v59, %v1407_v57  ;;  %v1541_v8 = vmax.f32 %v1479_v60, 0.0 }
 0x638   : > { %v1481_v2 = vpop.f32.mrf.mxu0 }
 0x639   : > { %v1482_v56 = vadd.f32 %v1481_v2, %v1407_v57  ;;  %v1544_v3 = vmax.f32 %v1490_v23, 0.0 }
 0x63a   : > { %v2415_v4 = vpop.f32.mrf.mxu0 }
 0x63b   : > { %v1542_v53 = vmax.f32 %v1482_v56, 0.0  ;;  %v1558_v42 = vpack.c.bf16 %v1544_v3, %v1543_v9  ;;  %v1503_v20 = vadd.f32 %v2415_v4, %v1407_v57 }
 0x63c   : > { %v1494_v7 = vpop.f32.mrf.mxu0 }
 0x63d   : > { %v1557_v41 = vpack.c.bf16 %v1542_v53, %v1541_v8  ;;  %v1495_v44 = vadd.f32 %v1494_v7, %v1407_v57  ;;  %v1547_v18 = vmax.f32 %v1503_v20, 0.0 }
 0x63e   : > { %v2416_v43 = vpop.f32.mrf.mxu0 }
 0x63f   : > { %v1506_v45 = vadd.f32 %v2416_v43, %v1407_v57  ;;  %2429 = vmatprep.mubr.msk.bf16.mxu1 %vm744_vm3, %v1557_v41  ;;  %v1545_v16 = vmax.f32 %v1495_v44, 0.0 }
 0x640   : > { %v1497_v46 = vpop.f32.mrf.mxu0  ;;  %2430 = vmatmul.mubr.msk.bf16.vlgmr.msra.gmra.mxu1 %vm744_vm3, %v1558_v42 }
 0x641   : > { %v1498_v13 = vadd.f32 %v1497_v46, %v1407_v57  ;;  %v1548_v47 = vmax.f32 %v1506_v45, 0.0 }
 0x642   : > { %v2419_v15 = vpop.f32.mrf.mxu0 }
 0x643   : > { %v1546_v17 = vmax.f32 %v1498_v13, 0.0  ;;  %v1560_v22 = vpack.c.bf16 %v1548_v47, %v1547_v18  ;;  %v1519_v27 = vadd.f32 %v2419_v15, %v1407_v57 }
 0x644   : > { %v1510_v19 = vpop.f32.mrf.mxu0 }
 0x645   : > { %v1559_v21 = vpack.c.bf16 %v1546_v17, %v1545_v16  ;;  %v1511_v24 = vadd.f32 %v1510_v19, %v1407_v57  ;;  %v1551_v25 = vmax.f32 %v1519_v27, 0.0 }
 0x646   : > { %v2420_v54 = vpop.f32.mrf.mxu0 }
 0x647   : > { %v1522_v26 = vadd.f32 %v2420_v54, %v1407_v57  ;;  %2433 = vmatprep.mubr.msk.bf16.mxu1 %vm744_vm3, %v1559_v21  ;;  %v1549_v36 = vmax.f32 %v1511_v24, 0.0 }
 0x648   : > { %v1513_v52 = vpop.f32.mrf.mxu0  ;;  %2434 = vmatmul.mubr.msk.bf16.gmra.mxu1 %vm744_vm3, %v1560_v22 }
 0x649   : > { %v1514_v63 = vadd.f32 %v1513_v52, %v1407_v57  ;;  %v1552_v30 = vmax.f32 %v1522_v26, 0.0 }
 0x64a   : > { %v2423_v35 = vpop.f32.mrf.mxu0 }
 0x64b   : > { %v1550_v37 = vmax.f32 %v1514_v63, 0.0  ;;  %v1562_v48 = vpack.c.bf16 %v1552_v30, %v1551_v25  ;;  %v1535_v62 = vadd.f32 %v2423_v35, %v1407_v57 }
 0x64c   : > { %v1526_v34 = vpop.f32.mrf.mxu0 }
 0x64d   : > { %v1561_v31 = vpack.c.bf16 %v1550_v37, %v1549_v36  ;;  %v1527_v14 = vadd.f32 %v1526_v34, %v1407_v57  ;;  %v1555_v12 = vmax.f32 %v1535_v62, 0.0 }
 0x64e   : > { %v2424_v51 = vpop.f32.mrf.mxu0 }
 0x64f   : > { %v1538_v61 = vadd.f32 %v2424_v51, %v1407_v57  ;;  %2437 = vmatprep.mubr.msk.bf16.mxu1 %vm744_vm3, %v1561_v31  ;;  %v1553_v58 = vmax.f32 %v1527_v14, 0.0 }
 0x650   : > { %v1529_v50 = vpop.f32.mrf.mxu0  ;;  %2438 = vmatmul.mubr.msk.bf16.gmra.mxu1 %vm744_vm3, %v1562_v48 }
 0x651   : > { %v1530_v5 = vadd.f32 %v1529_v50, %v1407_v57  ;;  %v1556_v6 = vmax.f32 %v1538_v61, 0.0 }
 0x653   : > { %v1554_v11 = vmax.f32 %v1530_v5, 0.0  ;;  %v1564_v39 = vpack.c.bf16 %v1556_v6, %v1555_v12 }
 0x655   : > { %v1563_v40 = vpack.c.bf16 %v1554_v11, %v1553_v58 }
 0x657   : > { %2441 = vmatprep.mubr.msk.bf16.mxu1 %vm744_vm3, %v1563_v40 }
 0x658   : > { %2442 = vmatmul.mubr.msk.bf16.gmra.mxu1 %vm744_vm3, %v1564_v39  ;;  %v1738_v39 = vsub.s32 5, %v2831_v29 }
 0x65a   : > { %v3061_v33 = vrot.slane %v2836_v32, %v1738_v39 }
 0x700   : > { %v2431_v28 = vpop.f32.mrf.mxu1 }
 0x701   : > { %v1653_v57 = vadd.f32 %v2431_v28, %v1573_v49 }
 0x702   : > { %v1644_v55 = vpop.f32.mrf.mxu1 }
 0x703   : > { %v1645_v60 = vadd.f32 %v1644_v55, %v1573_v49  ;;  %v1709_v53 = vmax.f32 %v1653_v57, 0.0 }
 0x704   : > { %v2432_v59 = vpop.f32.mrf.mxu1 }
 0x705   : > { %v1656_v23 = vadd.f32 %v2432_v59, %v1573_v49  ;;  %v1707_v4 = vmax.f32 %v1645_v60, 0.0 }
 0x706   : > { %v1647_v0 = vpop.f32.mrf.mxu1 }
 0x707   : > { %v1648_v2 = vadd.f32 %v1647_v0, %v1573_v49  ;;  %v1710_v56 = vmax.f32 %v1656_v23, 0.0  ;;  %v3071_v23 = vrot.slane %v2894_v10, %v2850_v38 }
 0x708   : > { %v2435_v3 = vpop.f32.mrf.mxu1 }
 0x709   : > { %v1708_v8 = vmax.f32 %v1648_v2, 0.0  ;;  %v1724_v41 = vpack.c.bf16 %v1710_v56, %v1709_v53  ;;  %v1669_v45 = vadd.f32 %v2435_v3, %v1573_v49 }
 0x70a   : > { %v1660_v9 = vpop.f32.mrf.mxu1 }
 0x70b   : > { %v1723_v7 = vpack.c.bf16 %v1708_v8, %v1707_v4  ;;  %v1661_v43 = vadd.f32 %v1660_v9, %v1573_v49  ;;  %v1713_v17 = vmax.f32 %v1669_v45, 0.0 }
 0x70c   : > { %v2436_v42 = vpop.f32.mrf.mxu1 }
 0x70d   : > { %v1672_v44 = vadd.f32 %v2436_v42, %v1573_v49  ;;  %2449 = vmatprep.mubr.msk.bf16.mxu0 %vm744_vm3, %v1723_v7  ;;  %v1711_v15 = vmax.f32 %v1661_v43, 0.0 }
 0x70e   : > { %v1663_v20 = vpop.f32.mrf.mxu1  ;;  %2450 = vmatmul.mubr.msk.bf16.vlgmr.msra.gmra.mxu0 %vm744_vm3, %v1724_v41 }
 0x70f   : > { %v1664_v46 = vadd.f32 %v1663_v20, %v1573_v49  ;;  %v1714_v13 = vmax.f32 %v1672_v44, 0.0 }
 0x710   : > { %v2439_v47 = vpop.f32.mrf.mxu1 }
 0x711   : > { %v1712_v16 = vmax.f32 %v1664_v46, 0.0  ;;  %v1726_v21 = vpack.c.bf16 %v1714_v13, %v1713_v17  ;;  %v1685_v26 = vadd.f32 %v2439_v47, %v1573_v49 }
 0x712   : > { %v1676_v18 = vpop.f32.mrf.mxu1 }
 0x713   : > { %v1725_v19 = vpack.c.bf16 %v1712_v16, %v1711_v15  ;;  %v1677_v54 = vadd.f32 %v1676_v18, %v1573_v49  ;;  %v1717_v37 = vmax.f32 %v1685_v26, 0.0 }
 0x714   : > { %v2440_v22 = vpop.f32.mrf.mxu1 }
 0x715   : > { %v1688_v24 = vadd.f32 %v2440_v22, %v1573_v49  ;;  %2453 = vmatprep.mubr.msk.bf16.mxu0 %vm744_vm3, %v1725_v19  ;;  %v1715_v35 = vmax.f32 %v1677_v54, 0.0 }
 0x716   : > { %v1679_v27 = vpop.f32.mrf.mxu1  ;;  %2454 = vmatmul.mubr.msk.bf16.gmra.mxu0 %vm744_vm3, %v1726_v21 }
 0x717   : > { %v1680_v52 = vadd.f32 %v1679_v27, %v1573_v49  ;;  %v1718_v63 = vmax.f32 %v1688_v24, 0.0 }
 0x718   : > { %v2443_v30 = vpop.f32.mrf.mxu1 }
 0x719   : > { %v1716_v36 = vmax.f32 %v1680_v52, 0.0  ;;  %v1728_v31 = vpack.c.bf16 %v1718_v63, %v1717_v37  ;;  %v1701_v61 = vadd.f32 %v2443_v30, %v1573_v49 }
 0x71a   : > { %v1692_v25 = vpop.f32.mrf.mxu1 }
 0x71b   : > { %v1727_v34 = vpack.c.bf16 %v1716_v36, %v1715_v35  ;;  %v1693_v51 = vadd.f32 %v1692_v25, %v1573_v49  ;;  %v1721_v11 = vmax.f32 %v1701_v61, 0.0 }
 0x71c   : > { %v2444_v48 = vpop.f32.mrf.mxu1 }
 0x71d   : > { %v1704_v14 = vadd.f32 %v2444_v48, %v1573_v49  ;;  %2457 = vmatprep.mubr.msk.bf16.mxu0 %vm744_vm3, %v1727_v34  ;;  %v1719_v6 = vmax.f32 %v1693_v51, 0.0 }
 0x71e   : > { %v1695_v62 = vpop.f32.mrf.mxu1  ;;  %2458 = vmatmul.mubr.msk.bf16.gmra.mxu0 %vm744_vm3, %v1728_v31 }
 0x71f   : > { %v1696_v50 = vadd.f32 %v1695_v62, %v1573_v49  ;;  %v1722_v5 = vmax.f32 %v1704_v14, 0.0  ;;  %v3066_v49 = vrot.slane %v2881_v1, %v2850_v38 }
 0x721   : > { %v1720_v58 = vmax.f32 %v1696_v50, 0.0  ;;  %v1730_v40 = vpack.c.bf16 %v1722_v5, %v1721_v11 }
 0x723   : > { %v1729_v12 = vpack.c.bf16 %v1720_v58, %v1719_v6 }
 0x725   : > { %2461 = vmatprep.mubr.msk.bf16.mxu0 %vm744_vm3, %v1729_v12 }
 0x726   : > { %2462 = vmatmul.mubr.msk.bf16.gmra.mxu0 %vm744_vm3, %v1730_v40 }
 0x7ce   : > { %v2451_v28 = vpop.f32.mrf.mxu0 }
 0x7cf   : > { %v1819_v55 = vadd.f32 %v2451_v28, %v3061_v33 }
 0x7d0   : > { %v1810_v59 = vpop.f32.mrf.mxu0 }
 0x7d1   : > { %v1875_v60 = vmax.f32 %v1819_v55, 0.0  ;;  %v1811_v57 = vadd.f32 %v1810_v59, %v3061_v33 }
 0x7d2   : > { %v2452_v29 = vpop.f32.mrf.mxu0 }
 0x7d3   : > { %v1895_v32 = vmul.f32 %v3066_v49, %v1875_v60  ;;  %v1873_v0 = vmax.f32 %v1811_v57, 0.0  ;;  %v1822_v2 = vadd.f32 %v2452_v29, %v3061_v33 }
 0x7d4   : > { %v1813_v1 = vpop.f32.mrf.mxu0 }
 0x7d5   : > { %v1915_v56 = vadd.f32 %v3071_v23, %v1895_v32  ;;  %v1893_v38 = vmul.f32 %v3066_v49, %v1873_v0  ;;  %v1876_v10 = vmax.f32 %v1822_v2, 0.0  ;;  %v1814_v3 = vadd.f32 %v1813_v1, %v3061_v33 }
 0x7d6   : > { %v2455_v4 = vpop.f32.mrf.mxu0 }
 0x7d7   : > { %1931 = vst.msk [vmem:[%s3079_s14 + $0x10] sm:$0xff] %vm744_vm3, %v1915_v56  ;;  %v1913_v8 = vadd.f32 %v3071_v23, %v1893_v38  ;;  %v1896_v53 = vmul.f32 %v3066_v49, %v1876_v10  ;;  %v1874_v9 = vmax.f32 %v1814_v3, 0.0  ;;  %v1835_v7 = vadd.f32 %v2455_v4, %v3061_v33 }
 0x7d8   : > { %v1826_v41 = vpop.f32.mrf.mxu0 }
 0x7d9   : > { %1929 = vst.msk [vmem:[%s3079_s14] sm:$0xff] %vm744_vm3, %v1913_v8  ;;  %v1916_v42 = vadd.f32 %v3071_v23, %v1896_v53  ;;  %v1894_v43 = vmul.f32 %v3066_v49, %v1874_v9  ;;  %v1879_v44 = vmax.f32 %v1835_v7, 0.0  ;;  %v1827_v45 = vadd.f32 %v1826_v41, %v3061_v33 }
 0x7da   : > { %v2456_v20 = vpop.f32.mrf.mxu0 }
 0x7db   : > { %1932 = vst.msk [vmem:[%s3079_s14 + $0x18] sm:$0xff] %vm744_vm3, %v1916_v42  ;;  %v1914_v46 = vadd.f32 %v3071_v23, %v1894_v43  ;;  %v1899_v13 = vmul.f32 %v3066_v49, %v1879_v44  ;;  %v1877_v47 = vmax.f32 %v1827_v45, 0.0  ;;  %v1838_v15 = vadd.f32 %v2456_v20, %v3061_v33 }
 0x7dc   : > { %v1829_v16 = vpop.f32.mrf.mxu0 }
 0x7dd   : > { %1930 = vst.msk [vmem:[%s3079_s14 + $0x8] sm:$0xff] %vm744_vm3, %v1914_v46  ;;  %v1919_v17 = vadd.f32 %v3071_v23, %v1899_v13  ;;  %v1897_v18 = vmul.f32 %v3066_v49, %v1877_v47  ;;  %v1880_v19 = vmax.f32 %v1838_v15, 0.0  ;;  %v1830_v21 = vadd.f32 %v1829_v16, %v3061_v33 }
 0x7de   : > { %v2459_v22 = vpop.f32.mrf.mxu0 }
 0x7df   : > { %1935 = vst.msk [vmem:[%s3079_s14 + $0x30] sm:$0xff] %vm744_vm3, %v1919_v17  ;;  %v1917_v54 = vadd.f32 %v3071_v23, %v1897_v18  ;;  %v1900_v24 = vmul.f32 %v3066_v49, %v1880_v19  ;;  %v1878_v26 = vmax.f32 %v1830_v21, 0.0  ;;  %v1851_v27 = vadd.f32 %v2459_v22, %v3061_v33 }
 0x7e0   : > { %v1842_v52 = vpop.f32.mrf.mxu0 }
 0x7e1   : > { %1933 = vst.msk [vmem:[%s3079_s14 + $0x20] sm:$0xff] %vm744_vm3, %v1917_v54  ;;  %v1920_v63 = vadd.f32 %v3071_v23, %v1900_v24  ;;  %v1898_v30 = vmul.f32 %v3066_v49, %v1878_v26  ;;  %v1883_v35 = vmax.f32 %v1851_v27, 0.0  ;;  %v1843_v36 = vadd.f32 %v1842_v52, %v3061_v33 }
 0x7e2   : > { %v2460_v37 = vpop.f32.mrf.mxu0 }
 0x7e3   : > { %1936 = vst.msk [vmem:[%s3079_s14 + $0x38] sm:$0xff] %vm744_vm3, %v1920_v63  ;;  %v1918_v25 = vadd.f32 %v3071_v23, %v1898_v30  ;;  %v1903_v34 = vmul.f32 %v3066_v49, %v1883_v35  ;;  %v1881_v31 = vmax.f32 %v1843_v36, 0.0  ;;  %v1854_v48 = vadd.f32 %v2460_v37, %v3061_v33 }
 0x7e4   : > { %v1845_v51 = vpop.f32.mrf.mxu0 }
 0x7e5   : > { %1934 = vst.msk [vmem:[%s3079_s14 + $0x28] sm:$0xff] %vm744_vm3, %v1918_v25  ;;  %v1923_v14 = vadd.f32 %v3071_v23, %v1903_v34  ;;  %v1901_v61 = vmul.f32 %v3066_v49, %v1881_v31  ;;  %v1884_v62 = vmax.f32 %v1854_v48, 0.0  ;;  %v1846_v50 = vadd.f32 %v1845_v51, %v3061_v33 }
 0x7e6   : > { %v2463_v5 = vpop.f32.mrf.mxu0 }
 0x7e7   : > { %1939 = vst.msk [vmem:[%s3079_s14 + $0x50] sm:$0xff] %vm744_vm3, %v1923_v14  ;;  %v1921_v6 = vadd.f32 %v3071_v23, %v1901_v61  ;;  %v1904_v58 = vmul.f32 %v3066_v49, %v1884_v62  ;;  %v1882_v11 = vmax.f32 %v1846_v50, 0.0  ;;  %v1867_v12 = vadd.f32 %v2463_v5, %v3061_v33 }
 0x7e8   : > { %v1858_v40 = vpop.f32.mrf.mxu0 }
 0x7e9   : > { %1937 = vst.msk [vmem:[%s3079_s14 + $0x40] sm:$0xff] %vm744_vm3, %v1921_v6  ;;  %v1924_v39 = vadd.f32 %v3071_v23, %v1904_v58  ;;  %v1902_v28 = vmul.f32 %v3066_v49, %v1882_v11  ;;  %v1887_v55 = vmax.f32 %v1867_v12, 0.0  ;;  %v1859_v59 = vadd.f32 %v1858_v40, %v3061_v33 }
 0x7ea   : > { %v2464_v60 = vpop.f32.mrf.mxu0 }
 0x7eb   : > { %1940 = vst.msk [vmem:[%s3079_s14 + $0x58] sm:$0xff] %vm744_vm3, %v1924_v39  ;;  %v1922_v57 = vadd.f32 %v3071_v23, %v1902_v28  ;;  %v1907_v29 = vmul.f32 %v3066_v49, %v1887_v55  ;;  %v1885_v32 = vmax.f32 %v1859_v59, 0.0  ;;  %v1870_v0 = vadd.f32 %v2464_v60, %v3061_v33 }
 0x7ec   : > { %v1861_v2 = vpop.f32.mrf.mxu0 }
 0x7ed   : > { %1938 = vst.msk [vmem:[%s3079_s14 + $0x48] sm:$0xff] %vm744_vm3, %v1922_v57  ;;  %v1927_v1 = vadd.f32 %v3071_v23, %v1907_v29  ;;  %v1905_v56 = vmul.f32 %v3066_v49, %v1885_v32  ;;  %v1888_v38 = vmax.f32 %v1870_v0, 0.0  ;;  %v1862_v10 = vadd.f32 %v1861_v2, %v3061_v33 }
 0x7ef   : > { %1943 = vst.msk [vmem:[%s3079_s14 + $0x70] sm:$0xff] %vm744_vm3, %v1927_v1  ;;  %v1925_v3 = vadd.f32 %v3071_v23, %v1905_v56  ;;  %v1908_v4 = vmul.f32 %v3066_v49, %v1888_v38  ;;  %v1886_v8 = vmax.f32 %v1862_v10, 0.0 }
 0x7f1   : > { %1941 = vst.msk [vmem:[%s3079_s14 + $0x60] sm:$0xff] %vm744_vm3, %v1925_v3  ;;  %v1928_v53 = vadd.f32 %v3071_v23, %v1908_v4  ;;  %v1906_v9 = vmul.f32 %v3066_v49, %v1886_v8 }
 0x7f3   : > { %1944 = vst.msk [vmem:[%s3079_s14 + $0x78] sm:$0xff] %vm744_vm3, %v1928_v53  ;;  %v1926_v7 = vadd.f32 %v3071_v23, %v1906_v9 }
 0x7f5   : > { %1942 = vst.msk [vmem:[%s3079_s14 + $0x68] sm:$0xff] %vm744_vm3, %v1926_v7 }
 0x7f6 PF: > { %s19_s24 = sadd.s32 1, %s2593_s24  }
 0x7f7   : > { %p16_p3 = scmp.ge.s32.totalorder %s19_s24, 10  }
 0x7f9   :  { %18 = sbr.rel (!%p16_p3) target bundleno = 2 (0x2), region = 95 }
 0x7fe   :  { %1967 = vsyncpa [#allocation3], 1 }
 0x7ff   :  { %1969 = vsyncpa [#allocation3 + $0x1], 1 }
 0x800   :  { %1970 = vsyncpa [#allocation5], 1 }

</bundles_post_ra>
